<compile_context>
chip_gen: v6e
topology: v6e:2x2x1
jax: 0.10.0
libtpu: 0.0.40
codegen_flags: <defaults>
</compile_context>

<pallas_src>
import numpy as np
import jax
import jax.numpy as jnp
from jax.experimental import pallas as pl
from jax.experimental.pallas import tpu as pltpu

_HAAR = 0.7071067811865476            # 1/sqrt(2), pywt 'haar' tap
_SCALE = float(_HAAR ** 3)            # per-output scale of the 3-D inverse transform
_VMEM_LIMIT = 32 * 1024 * 1024        # scoped VMEM cap (>= v5e 16MiB default, <= v7x 64MiB phys)
_IN_BLOCK_BYTES = 256 * 1024          # per-subband block budget (x16 streams + f32 temps fit cap)
_FUSED_MAX_LIN = 128                  # fused (in-kernel interleave) path gate on Hh*Wh


# ------------------------------- shared in-kernel butterfly -------------------------------

def _butterfly_corners(sub):
    """3-stage Haar butterfly. sub[k], k = 4a+2b+e -> dict corner[(p,q,r)] (scaled), elementwise."""
    w_st = {}
    for a in (0, 1):
        for b in (0, 1):
            lo, hi = sub[4 * a + 2 * b + 0], sub[4 * a + 2 * b + 1]
            w_st[(a, b, 0)] = lo + hi
            w_st[(a, b, 1)] = lo - hi
    h_st = {}
    for a in (0, 1):
        for r in (0, 1):
            lo, hi = w_st[(a, 0, r)], w_st[(a, 1, r)]
            h_st[(a, 0, r)] = lo + hi
            h_st[(a, 1, r)] = lo - hi
    corner = {}
    for q in (0, 1):
        for r in (0, 1):
            lo, hi = h_st[(0, q, r)], h_st[(1, q, r)]
            corner[(0, q, r)] = _SCALE * (lo + hi)
            corner[(1, q, r)] = _SCALE * (lo - hi)
    return corner


# ------------------------------------ fused path kernels ----------------------------------

def _idwt_fused_kernel(e_ref, lll, llh, lhl, lhh, hll, hlh, hhl, hhh, o_ref):
    """Blocks: e_ref (4, Lin, Lhalf) bf16 0/1; subbands (1, TR, Lin); o_ref (1, TR, Lout=2*Lhalf).

    Writes the final interleaved layout: o[t, p*Lhalf + 4*Wh*h + 2*Wh*q + 2*w + r] = corner_pqr[t,h,w].
    The (h,q,w,r) spreading is done via MXU matmuls with constant 0/1 matrices (MXU is idle in
    this HBM-bound kernel); a 2-term bf16 split keeps ~f32 accuracy.
    """
    f32 = jnp.float32
    sub = [r_[0].astype(f32) for r_ in (lll, llh, lhl, lhh, hll, hlh, hhl, hhh)]
    corner = _butterfly_corners(sub)
    lhalf = e_ref.shape[2]
    for p in (0, 1):
        acc = None
        for q in (0, 1):
            for r in (0, 1):
                c = corner[(p, q, r)]
                e = e_ref[2 * q + r]                            # (Lin, Lhalf), exact 0/1 in bf16
                c_hi = c.astype(jnp.bfloat16)
                c_lo = (c - c_hi.astype(f32)).astype(jnp.bfloat16)
                part = jnp.dot(c_hi, e, preferred_element_type=f32)
                part = part + jnp.dot(c_lo, e, preferred_element_type=f32)
                acc = part if acc is None else acc + part
        o_ref[0, :, p * lhalf:(p + 1) * lhalf] = acc.astype(o_ref.dtype)


def _feature_copy_kernel(f_ref, y_ref, o_ref):
    del y_ref  # aliased with the output buffer; only threaded through for input_output_aliases
    o_ref[...] = f_ref[...].astype(o_ref.dtype)


def _spread_matrices(Hh, Wh):
    """E[2q+r, h*Wh+w, 4*Wh*h + 2*Wh*q + 2*w + r] = 1 ; everything else 0."""
    Lin, Lhalf = Hh * Wh, 4 * Hh * Wh
    E = np.zeros((4, Lin, Lhalf), np.float32)
    for h in range(Hh):
        for w in range(Wh):
            i = h * Wh + w
            for q in (0, 1):
                for r in (0, 1):
                    E[2 * q + r, i, 4 * Wh * h + 2 * Wh * q + 2 * w + r] = 1.0
    return jnp.asarray(E, dtype=jnp.bfloat16)   # 0/1 are exact in bf16


def _fused_path(subs, feature_map, out_dtype):
    N, C, Dh, Hh, Wh = subs[0].shape
    Cf = feature_map.shape[1]
    Lin, Lhalf, Lout = Hh * Wh, 4 * Hh * Wh, 8 * Hh * Wh
    m_rows = C * Dh                       # y rows per sample   (row = (c, d))
    r_rows = (C + Cf) * Dh                # output rows per sample (y rows, then feature rows)

    isz = subs[0].dtype.itemsize
    tr = max(1, min(m_rows, _IN_BLOCK_BYTES // max(1, Lin * isz)))
    if tr > 8:
        tr -= tr % 8                      # keep the sublane dim a multiple of 8

    in3 = [s.reshape(N, m_rows, Lin) for s in subs]
    E = _spread_matrices(Hh, Wh)

    ybuf = pl.pallas_call(
        _idwt_fused_kernel,
        out_shape=jax.ShapeDtypeStruct((N, r_rows, Lout), out_dtype),
        grid=(N, pl.cdiv(m_rows, tr)),
        in_specs=[pl.BlockSpec((4, Lin, Lhalf), lambda n, rb: (0, 0, 0))]
                 + [pl.BlockSpec((1, tr, Lin), lambda n, rb: (n, rb, 0)) for _ in range(8)],
        out_specs=pl.BlockSpec((1, tr, Lout), lambda n, rb: (n, rb, 0)),
        compiler_params=pltpu.CompilerParams(
            dimension_semantics=("parallel", "parallel"),
            vmem_limit_bytes=_VMEM_LIMIT),
    )(E, *in3)
    # If m_rows % tr != 0 the last block spills garbage into the first feature rows of the
    # buffer; the feature-copy call below overwrites all feature rows, so the result is clean.

    buf4 = ybuf.reshape(N, C + Cf, Dh, Lout)            # free reshape of the same buffer
    fm4 = feature_map.reshape(N, Cf, Dh, Lout)          # free reshape of NCDHW feature_map
    osz = jnp.dtype(out_dtype).itemsize
    td = max(1, min(Dh, (512 * 1024) // max(1, Lout * osz)))

    out4 = pl.pallas_call(
        _feature_copy_kernel,
        out_shape=jax.ShapeDtypeStruct((N, C + Cf, Dh, Lout), out_dtype),
        grid=(N, Cf, pl.cdiv(Dh, td)),
        in_specs=[pl.BlockSpec((1, 1, td, Lout), lambda n, c, db: (n, c, db, 0)),
                  pl.BlockSpec(memory_space=pl.ANY)],
        out_specs=pl.BlockSpec((1, 1, td, Lout), lambda n, c, db: (n, C + c, db, 0)),
        input_output_aliases={1: 0},       # write feature channels into the y buffer in place
        compiler_params=pltpu.CompilerParams(
            dimension_semantics=("parallel", "parallel", "parallel"),
            vmem_limit_bytes=_VMEM_LIMIT),
    )(fm4, buf4)

    return out4.reshape(N, C + Cf, 2 * Dh, 2 * Hh, 2 * Wh)


# --------------------------- fallback path (large spatial planes) --------------------------

def _idwt_corner_kernel(lll, llh, lhl, lhh, hll, hlh, hhl, hhh, o_ref):
    """Inputs (TR, LANE); output (8, TR, LANE) with corner index k = 4p + 2q + r."""
    f32 = jnp.float32
    sub = [r_[...].astype(f32) for r_ in (lll, llh, lhl, lhh, hll, hlh, hhl, hhh)]
    corner = _butterfly_corners(sub)
    for p in (0, 1):
        for q in (0, 1):
            for r in (0, 1):
                o_ref[4 * p + 2 * q + r] = corner[(p, q, r)].astype(o_ref.dtype)


def _fallback_path(subs, feature_map, out_dtype):
    # Large planes: the in-kernel MXU spreading would be MXU-bound and E would not fit VMEM,
    # so keep the lane-dense butterfly kernel and let XLA do the stride-2 interleave + concat.
    # TODO(synk): fold the interleave into the kernel for large planes too (strided DMA writes).
    N, C, Dh, Hh, Wh = subs[0].shape
    total = N * C * Dh * Hh * Wh
    lane = next((c for c in (512, 256, 128) if total % c == 0), None)
    pad = 0
    if lane is None:                      # keep stores lane-dense: pad instead of shrinking
        lane = 128
        pad = (-total) % lane
    rows = (total + pad) // lane

    flat = []
    for s in subs:
        f = s.reshape(total)
        if pad:
            f = jnp.pad(f, (0, pad))
        flat.append(f.reshape(rows, lane))

    isz = subs[0].dtype.itemsize
    tr = min(rows, max(8, _IN_BLOCK_BYTES // (lane * isz)))
    if tr > 8:
        tr -= tr % 8

    corners = pl.pallas_call(
        _idwt_corner_kernel,
        out_shape=jax.ShapeDtypeStruct((8, rows, lane), out_dtype),
        grid=(pl.cdiv(rows, tr),),
        in_specs=[pl.BlockSpec((tr, lane), lambda i: (i, 0)) for _ in range(8)],
        out_specs=pl.BlockSpec((8, tr, lane), lambda i: (0, i, 0)),
        compiler_params=pltpu.CompilerParams(dimension_semantics=("parallel",),
                                             vmem_limit_bytes=_VMEM_LIMIT),
    )(*flat)

    if pad:
        corners = corners.reshape(8, rows * lane)[:, :total]
    y = corners.reshape(2, 2, 2, N, C, Dh, Hh, Wh)            # (p, q, r, n, c, d, h, w)
    y = y.transpose(3, 4, 5, 0, 6, 1, 7, 2)                   # (n, c, d, p, h, q, w, r)
    y = y.reshape(N, C, 2 * Dh, 2 * Hh, 2 * Wh)
    return jnp.concatenate([y, feature_map.astype(out_dtype)], axis=1)


# ------------------------------------------ wrapper ----------------------------------------

@jax.jit
def my_upsampling_idwt_3d(LLL, LLH, LHL, LHH, HLL, HLH, HHL, HHH, feature_map):
    subs = (LLL, LLH, LHL, LHH, HLL, HLH, HHL, HHH)
    shape, dtype = subs[0].shape, subs[0].dtype
    assert all(s.shape == shape and s.dtype == dtype for s in subs), \
        "all 8 subbands must share shape and dtype"
    N, C, Dh, Hh, Wh = shape
    assert feature_map.shape[0] == N and feature_map.shape[2:] == (2 * Dh, 2 * Hh, 2 * Wh), \
        "feature_map spatial dims must be 2x the subband spatial dims"

    out_dtype = jnp.result_type(dtype, feature_map.dtype)
    if Hh * Wh <= _FUSED_MAX_LIN:
        return _fused_path(subs, feature_map, out_dtype)
    return _fallback_path(subs, feature_map, out_dtype)


# --------------------- pure numpy reference (matrix form, as in the torch code) -------------

def _haar_mats_np(n):
    L = np.zeros((n // 2, n), np.float64)
    G = np.zeros((n // 2, n), np.float64)
    for i in range(n // 2):
        L[i, 2 * i] = _HAAR
        L[i, 2 * i + 1] = _HAAR
        G[i, 2 * i] = _HAAR
        G[i, 2 * i + 1] = -_HAAR
    return L, G


def _reference(subs, fmap):
    subs_np = [np.asarray(s, np.float64) for s in subs]
    N, C, Dh, Hh, Wh = subs_np[0].shape
    Fd, Fh, Fw = _haar_mats_np(2 * Dh), _haar_mats_np(2 * Hh), _haar_mats_np(2 * Wh)
    out = np.zeros((N, C, 2 * Dh, 2 * Hh, 2 * Wh), np.float64)
    for idx in range(8):
        a, b, e = (idx >> 2) & 1, (idx >> 1) & 1, idx & 1
        x = subs_np[idx]
        x = np.einsum('ncdhw,wW->ncdhW', x, Fw[e])
        x = np.einsum('ncdhw,hH->ncdHw', x, Fh[b])
        x = np.einsum('ncdhw,dD->ncDhw', x, Fd[a])
        out = out + x
    return np.concatenate([out, np.asarray(fmap, np.float64)], axis=1)


if __name__ == "__main__":
    key = jax.random.PRNGKey(0)
    N, C, Cf, Dh, Hh, Wh = 2, 4, 3, 8, 8, 8
    keys = jax.random.split(key, 9)
    subs = [jax.random.normal(keys[i], (N, C, Dh, Hh, Wh), jnp.float32) for i in range(8)]
    fmap = jax.random.normal(keys[8], (N, Cf, 2 * Dh, 2 * Hh, 2 * Wh), jnp.float32)

    out = my_upsampling_idwt_3d(*subs, fmap)
    out = jax.block_until_ready(out)

    assert out.shape == (N, C + Cf, 2 * Dh, 2 * Hh, 2 * Wh), out.shape
    ref = _reference(subs, fmap)
    out_np = np.asarray(out, np.float64)
    err = float(np.max(np.abs(out_np - ref)))
    assert np.allclose(out_np, ref, atol=2e-4, rtol=2e-4), err

    print("KERNEL_OK")
</pallas_src>

<mosaic_0001>
module attributes {stable_mosaic.version = 11 : i64} {
  func.func @_idwt_fused_kernel(%arg0: i32, %arg1: i32, %arg2: memref<4x64x256xbf16, #tpu.memory_space<vmem>>, %arg3: memref<1x32x64xf32, #tpu.memory_space<vmem>>, %arg4: memref<1x32x64xf32, #tpu.memory_space<vmem>>, %arg5: memref<1x32x64xf32, #tpu.memory_space<vmem>>, %arg6: memref<1x32x64xf32, #tpu.memory_space<vmem>>, %arg7: memref<1x32x64xf32, #tpu.memory_space<vmem>>, %arg8: memref<1x32x64xf32, #tpu.memory_space<vmem>>, %arg9: memref<1x32x64xf32, #tpu.memory_space<vmem>>, %arg10: memref<1x32x64xf32, #tpu.memory_space<vmem>>, %arg11: memref<1x32x512xf32, #tpu.memory_space<vmem>>) attributes {dimension_semantics = [#tpu.dimension_semantics<parallel>, #tpu.dimension_semantics<parallel>], iteration_bounds = array<i64: 2, 1>, scalar_prefetch = 0 : i64, scratch_operands = 0 : i64, tpu.core_type = #tpu.core_type<tc>, window_params = [{pipeline_mode = #tpu.pipeline_mode<synchronous>, transform_indices = @transform_0, window_bounds = array<i64: 4, 64, 256>}, {transform_indices = @transform_1, window_bounds = array<i64: 1, 32, 64>}, {transform_indices = @transform_2, window_bounds = array<i64: 1, 32, 64>}, {transform_indices = @transform_3, window_bounds = array<i64: 1, 32, 64>}, {transform_indices = @transform_4, window_bounds = array<i64: 1, 32, 64>}, {transform_indices = @transform_5, window_bounds = array<i64: 1, 32, 64>}, {transform_indices = @transform_6, window_bounds = array<i64: 1, 32, 64>}, {transform_indices = @transform_7, window_bounds = array<i64: 1, 32, 64>}, {transform_indices = @transform_8, window_bounds = array<i64: 1, 32, 64>}, {transform_indices = @transform_9, window_bounds = array<i64: 1, 32, 512>}]} {
    %c0 = arith.constant 0 : index
    %c0_0 = arith.constant 0 : index
    %c0_1 = arith.constant 0 : index
    %0 = vector.load %arg3[%c0, %c0_0, %c0_1] : memref<1x32x64xf32, #tpu.memory_space<vmem>>, vector<1x32x64xf32>
    %1 = vector.shape_cast %0 : vector<1x32x64xf32> to vector<32x64xf32>
    %c0_2 = arith.constant 0 : index
    %c0_3 = arith.constant 0 : index
    %c0_4 = arith.constant 0 : index
    %2 = vector.load %arg4[%c0_2, %c0_3, %c0_4] : memref<1x32x64xf32, #tpu.memory_space<vmem>>, vector<1x32x64xf32>
    %3 = vector.shape_cast %2 : vector<1x32x64xf32> to vector<32x64xf32>
    %c0_5 = arith.constant 0 : index
    %c0_6 = arith.constant 0 : index
    %c0_7 = arith.constant 0 : index
    %4 = vector.load %arg5[%c0_5, %c0_6, %c0_7] : memref<1x32x64xf32, #tpu.memory_space<vmem>>, vector<1x32x64xf32>
    %5 = vector.shape_cast %4 : vector<1x32x64xf32> to vector<32x64xf32>
    %c0_8 = arith.constant 0 : index
    %c0_9 = arith.constant 0 : index
    %c0_10 = arith.constant 0 : index
    %6 = vector.load %arg6[%c0_8, %c0_9, %c0_10] : memref<1x32x64xf32, #tpu.memory_space<vmem>>, vector<1x32x64xf32>
    %7 = vector.shape_cast %6 : vector<1x32x64xf32> to vector<32x64xf32>
    %c0_11 = arith.constant 0 : index
    %c0_12 = arith.constant 0 : index
    %c0_13 = arith.constant 0 : index
    %8 = vector.load %arg7[%c0_11, %c0_12, %c0_13] : memref<1x32x64xf32, #tpu.memory_space<vmem>>, vector<1x32x64xf32>
    %9 = vector.shape_cast %8 : vector<1x32x64xf32> to vector<32x64xf32>
    %c0_14 = arith.constant 0 : index
    %c0_15 = arith.constant 0 : index
    %c0_16 = arith.constant 0 : index
    %10 = vector.load %arg8[%c0_14, %c0_15, %c0_16] : memref<1x32x64xf32, #tpu.memory_space<vmem>>, vector<1x32x64xf32>
    %11 = vector.shape_cast %10 : vector<1x32x64xf32> to vector<32x64xf32>
    %c0_17 = arith.constant 0 : index
    %c0_18 = arith.constant 0 : index
    %c0_19 = arith.constant 0 : index
    %12 = vector.load %arg9[%c0_17, %c0_18, %c0_19] : memref<1x32x64xf32, #tpu.memory_space<vmem>>, vector<1x32x64xf32>
    %13 = vector.shape_cast %12 : vector<1x32x64xf32> to vector<32x64xf32>
    %c0_20 = arith.constant 0 : index
    %c0_21 = arith.constant 0 : index
    %c0_22 = arith.constant 0 : index
    %14 = vector.load %arg10[%c0_20, %c0_21, %c0_22] : memref<1x32x64xf32, #tpu.memory_space<vmem>>, vector<1x32x64xf32>
    %15 = vector.shape_cast %14 : vector<1x32x64xf32> to vector<32x64xf32>
    %16 = arith.addf %1, %3 : vector<32x64xf32>
    %17 = arith.subf %1, %3 : vector<32x64xf32>
    %18 = arith.addf %5, %7 : vector<32x64xf32>
    %19 = arith.subf %5, %7 : vector<32x64xf32>
    %20 = arith.addf %9, %11 : vector<32x64xf32>
    %21 = arith.subf %9, %11 : vector<32x64xf32>
    %22 = arith.addf %13, %15 : vector<32x64xf32>
    %23 = arith.subf %13, %15 : vector<32x64xf32>
    %24 = arith.addf %16, %18 : vector<32x64xf32>
    %25 = arith.subf %16, %18 : vector<32x64xf32>
    %26 = arith.addf %17, %19 : vector<32x64xf32>
    %27 = arith.subf %17, %19 : vector<32x64xf32>
    %28 = arith.addf %20, %22 : vector<32x64xf32>
    %29 = arith.subf %20, %22 : vector<32x64xf32>
    %30 = arith.addf %21, %23 : vector<32x64xf32>
    %31 = arith.subf %21, %23 : vector<32x64xf32>
    %32 = arith.addf %24, %28 : vector<32x64xf32>
    %cst = arith.constant 0.353553385 : f32
    %33 = vector.broadcast %cst : f32 to vector<32x64xf32>
    %34 = arith.mulf %33, %32 : vector<32x64xf32>
    %35 = arith.subf %24, %28 : vector<32x64xf32>
    %cst_23 = arith.constant 0.353553385 : f32
    %36 = vector.broadcast %cst_23 : f32 to vector<32x64xf32>
    %37 = arith.mulf %36, %35 : vector<32x64xf32>
    %38 = arith.addf %26, %30 : vector<32x64xf32>
    %cst_24 = arith.constant 0.353553385 : f32
    %39 = vector.broadcast %cst_24 : f32 to vector<32x64xf32>
    %40 = arith.mulf %39, %38 : vector<32x64xf32>
    %41 = arith.subf %26, %30 : vector<32x64xf32>
    %cst_25 = arith.constant 0.353553385 : f32
    %42 = vector.broadcast %cst_25 : f32 to vector<32x64xf32>
    %43 = arith.mulf %42, %41 : vector<32x64xf32>
    %44 = arith.addf %25, %29 : vector<32x64xf32>
    %cst_26 = arith.constant 0.353553385 : f32
    %45 = vector.broadcast %cst_26 : f32 to vector<32x64xf32>
    %46 = arith.mulf %45, %44 : vector<32x64xf32>
    %47 = arith.subf %25, %29 : vector<32x64xf32>
    %cst_27 = arith.constant 0.353553385 : f32
    %48 = vector.broadcast %cst_27 : f32 to vector<32x64xf32>
    %49 = arith.mulf %48, %47 : vector<32x64xf32>
    %50 = arith.addf %27, %31 : vector<32x64xf32>
    %cst_28 = arith.constant 0.353553385 : f32
    %51 = vector.broadcast %cst_28 : f32 to vector<32x64xf32>
    %52 = arith.mulf %51, %50 : vector<32x64xf32>
    %53 = arith.subf %27, %31 : vector<32x64xf32>
    %cst_29 = arith.constant 0.353553385 : f32
    %54 = vector.broadcast %cst_29 : f32 to vector<32x64xf32>
    %55 = arith.mulf %54, %53 : vector<32x64xf32>
    %c0_30 = arith.constant 0 : index
    %c0_31 = arith.constant 0 : index
    %c0_32 = arith.constant 0 : index
    %56 = vector.load %arg2[%c0_30, %c0_31, %c0_32] : memref<4x64x256xbf16, #tpu.memory_space<vmem>>, vector<1x64x256xbf16>
    %57 = vector.shape_cast %56 : vector<1x64x256xbf16> to vector<64x256xbf16>
    %58 = arith.truncf %34 : vector<32x64xf32> to vector<32x64xbf16>
    %59 = arith.extf %58 : vector<32x64xbf16> to vector<32x64xf32>
    %60 = arith.subf %34, %59 : vector<32x64xf32>
    %61 = arith.truncf %60 : vector<32x64xf32> to vector<32x64xbf16>
    %cst_33 = arith.constant dense<0.000000e+00> : vector<32x256xf32>
    %62 = tpu.matmul %58, %57, %cst_33 {dimension_numbers = #tpu.dot_dimension_numbers<[1], [0], [0], [1], [0, 0, 1, 1], [], []>} : vector<32x64xbf16>, vector<64x256xbf16>, vector<32x256xf32> -> vector<32x256xf32>
    %cst_34 = arith.constant dense<0.000000e+00> : vector<32x256xf32>
    %63 = tpu.matmul %61, %57, %cst_34 {dimension_numbers = #tpu.dot_dimension_numbers<[1], [0], [0], [1], [0, 0, 1, 1], [], []>} : vector<32x64xbf16>, vector<64x256xbf16>, vector<32x256xf32> -> vector<32x256xf32>
    %64 = arith.addf %62, %63 : vector<32x256xf32>
    %c1 = arith.constant 1 : index
    %c0_35 = arith.constant 0 : index
    %c0_36 = arith.constant 0 : index
    %65 = vector.load %arg2[%c1, %c0_35, %c0_36] : memref<4x64x256xbf16, #tpu.memory_space<vmem>>, vector<1x64x256xbf16>
    %66 = vector.shape_cast %65 : vector<1x64x256xbf16> to vector<64x256xbf16>
    %67 = arith.truncf %40 : vector<32x64xf32> to vector<32x64xbf16>
    %68 = arith.extf %67 : vector<32x64xbf16> to vector<32x64xf32>
    %69 = arith.subf %40, %68 : vector<32x64xf32>
    %70 = arith.truncf %69 : vector<32x64xf32> to vector<32x64xbf16>
    %cst_37 = arith.constant dense<0.000000e+00> : vector<32x256xf32>
    %71 = tpu.matmul %67, %66, %cst_37 {dimension_numbers = #tpu.dot_dimension_numbers<[1], [0], [0], [1], [0, 0, 1, 1], [], []>} : vector<32x64xbf16>, vector<64x256xbf16>, vector<32x256xf32> -> vector<32x256xf32>
    %cst_38 = arith.constant dense<0.000000e+00> : vector<32x256xf32>
    %72 = tpu.matmul %70, %66, %cst_38 {dimension_numbers = #tpu.dot_dimension_numbers<[1], [0], [0], [1], [0, 0, 1, 1], [], []>} : vector<32x64xbf16>, vector<64x256xbf16>, vector<32x256xf32> -> vector<32x256xf32>
    %73 = arith.addf %71, %72 : vector<32x256xf32>
    %74 = arith.addf %64, %73 : vector<32x256xf32>
    %c2 = arith.constant 2 : index
    %c0_39 = arith.constant 0 : index
    %c0_40 = arith.constant 0 : index
    %75 = vector.load %arg2[%c2, %c0_39, %c0_40] : memref<4x64x256xbf16, #tpu.memory_space<vmem>>, vector<1x64x256xbf16>
    %76 = vector.shape_cast %75 : vector<1x64x256xbf16> to vector<64x256xbf16>
    %77 = arith.truncf %46 : vector<32x64xf32> to vector<32x64xbf16>
    %78 = arith.extf %77 : vector<32x64xbf16> to vector<32x64xf32>
    %79 = arith.subf %46, %78 : vector<32x64xf32>
    %80 = arith.truncf %79 : vector<32x64xf32> to vector<32x64xbf16>
    %cst_41 = arith.constant dense<0.000000e+00> : vector<32x256xf32>
    %81 = tpu.matmul %77, %76, %cst_41 {dimension_numbers = #tpu.dot_dimension_numbers<[1], [0], [0], [1], [0, 0, 1, 1], [], []>} : vector<32x64xbf16>, vector<64x256xbf16>, vector<32x256xf32> -> vector<32x256xf32>
    %cst_42 = arith.constant dense<0.000000e+00> : vector<32x256xf32>
    %82 = tpu.matmul %80, %76, %cst_42 {dimension_numbers = #tpu.dot_dimension_numbers<[1], [0], [0], [1], [0, 0, 1, 1], [], []>} : vector<32x64xbf16>, vector<64x256xbf16>, vector<32x256xf32> -> vector<32x256xf32>
    %83 = arith.addf %81, %82 : vector<32x256xf32>
    %84 = arith.addf %74, %83 : vector<32x256xf32>
    %c3 = arith.constant 3 : index
    %c0_43 = arith.constant 0 : index
    %c0_44 = arith.constant 0 : index
    %85 = vector.load %arg2[%c3, %c0_43, %c0_44] : memref<4x64x256xbf16, #tpu.memory_space<vmem>>, vector<1x64x256xbf16>
    %86 = vector.shape_cast %85 : vector<1x64x256xbf16> to vector<64x256xbf16>
    %87 = arith.truncf %52 : vector<32x64xf32> to vector<32x64xbf16>
    %88 = arith.extf %87 : vector<32x64xbf16> to vector<32x64xf32>
    %89 = arith.subf %52, %88 : vector<32x64xf32>
    %90 = arith.truncf %89 : vector<32x64xf32> to vector<32x64xbf16>
    %cst_45 = arith.constant dense<0.000000e+00> : vector<32x256xf32>
    %91 = tpu.matmul %87, %86, %cst_45 {dimension_numbers = #tpu.dot_dimension_numbers<[1], [0], [0], [1], [0, 0, 1, 1], [], []>} : vector<32x64xbf16>, vector<64x256xbf16>, vector<32x256xf32> -> vector<32x256xf32>
    %cst_46 = arith.constant dense<0.000000e+00> : vector<32x256xf32>
    %92 = tpu.matmul %90, %86, %cst_46 {dimension_numbers = #tpu.dot_dimension_numbers<[1], [0], [0], [1], [0, 0, 1, 1], [], []>} : vector<32x64xbf16>, vector<64x256xbf16>, vector<32x256xf32> -> vector<32x256xf32>
    %93 = arith.addf %91, %92 : vector<32x256xf32>
    %94 = arith.addf %84, %93 : vector<32x256xf32>
    %c0_47 = arith.constant 0 : index
    %c0_48 = arith.constant 0 : index
    %c0_49 = arith.constant 0 : index
    %95 = vector.load %arg11[%c0_47, %c0_48, %c0_49] : memref<1x32x512xf32, #tpu.memory_space<vmem>>, vector<1x32x256xf32>
    %96 = vector.shape_cast %95 : vector<1x32x256xf32> to vector<32x256xf32>
    %97 = vector.shape_cast %94 : vector<32x256xf32> to vector<1x32x256xf32>
    tpu.vector_store %arg11[%c0_47, %c0_48, %c0_49], %97 {strides = array<i32>} : memref<1x32x512xf32, #tpu.memory_space<vmem>>, vector<1x32x256xf32>,
    %c0_50 = arith.constant 0 : index
    %c0_51 = arith.constant 0 : index
    %c0_52 = arith.constant 0 : index
    %98 = vector.load %arg2[%c0_50, %c0_51, %c0_52] : memref<4x64x256xbf16, #tpu.memory_space<vmem>>, vector<1x64x256xbf16>
    %99 = vector.shape_cast %98 : vector<1x64x256xbf16> to vector<64x256xbf16>
    %100 = arith.truncf %37 : vector<32x64xf32> to vector<32x64xbf16>
    %101 = arith.extf %100 : vector<32x64xbf16> to vector<32x64xf32>
    %102 = arith.subf %37, %101 : vector<32x64xf32>
    %103 = arith.truncf %102 : vector<32x64xf32> to vector<32x64xbf16>
    %cst_53 = arith.constant dense<0.000000e+00> : vector<32x256xf32>
    %104 = tpu.matmul %100, %99, %cst_53 {dimension_numbers = #tpu.dot_dimension_numbers<[1], [0], [0], [1], [0, 0, 1, 1], [], []>} : vector<32x64xbf16>, vector<64x256xbf16>, vector<32x256xf32> -> vector<32x256xf32>
    %cst_54 = arith.constant dense<0.000000e+00> : vector<32x256xf32>
    %105 = tpu.matmul %103, %99, %cst_54 {dimension_numbers = #tpu.dot_dimension_numbers<[1], [0], [0], [1], [0, 0, 1, 1], [], []>} : vector<32x64xbf16>, vector<64x256xbf16>, vector<32x256xf32> -> vector<32x256xf32>
    %106 = arith.addf %104, %105 : vector<32x256xf32>
    %c1_55 = arith.constant 1 : index
    %c0_56 = arith.constant 0 : index
    %c0_57 = arith.constant 0 : index
    %107 = vector.load %arg2[%c1_55, %c0_56, %c0_57] : memref<4x64x256xbf16, #tpu.memory_space<vmem>>, vector<1x64x256xbf16>
    %108 = vector.shape_cast %107 : vector<1x64x256xbf16> to vector<64x256xbf16>
    %109 = arith.truncf %43 : vector<32x64xf32> to vector<32x64xbf16>
    %110 = arith.extf %109 : vector<32x64xbf16> to vector<32x64xf32>
    %111 = arith.subf %43, %110 : vector<32x64xf32>
    %112 = arith.truncf %111 : vector<32x64xf32> to vector<32x64xbf16>
    %cst_58 = arith.constant dense<0.000000e+00> : vector<32x256xf32>
    %113 = tpu.matmul %109, %108, %cst_58 {dimension_numbers = #tpu.dot_dimension_numbers<[1], [0], [0], [1], [0, 0, 1, 1], [], []>} : vector<32x64xbf16>, vector<64x256xbf16>, vector<32x256xf32> -> vector<32x256xf32>
    %cst_59 = arith.constant dense<0.000000e+00> : vector<32x256xf32>
    %114 = tpu.matmul %112, %108, %cst_59 {dimension_numbers = #tpu.dot_dimension_numbers<[1], [0], [0], [1], [0, 0, 1, 1], [], []>} : vector<32x64xbf16>, vector<64x256xbf16>, vector<32x256xf32> -> vector<32x256xf32>
    %115 = arith.addf %113, %114 : vector<32x256xf32>
    %116 = arith.addf %106, %115 : vector<32x256xf32>
    %c2_60 = arith.constant 2 : index
    %c0_61 = arith.constant 0 : index
    %c0_62 = arith.constant 0 : index
    %117 = vector.load %arg2[%c2_60, %c0_61, %c0_62] : memref<4x64x256xbf16, #tpu.memory_space<vmem>>, vector<1x64x256xbf16>
    %118 = vector.shape_cast %117 : vector<1x64x256xbf16> to vector<64x256xbf16>
    %119 = arith.truncf %49 : vector<32x64xf32> to vector<32x64xbf16>
    %120 = arith.extf %119 : vector<32x64xbf16> to vector<32x64xf32>
    %121 = arith.subf %49, %120 : vector<32x64xf32>
    %122 = arith.truncf %121 : vector<32x64xf32> to vector<32x64xbf16>
    %cst_63 = arith.constant dense<0.000000e+00> : vector<32x256xf32>
    %123 = tpu.matmul %119, %118, %cst_63 {dimension_numbers = #tpu.dot_dimension_numbers<[1], [0], [0], [1], [0, 0, 1, 1], [], []>} : vector<32x64xbf16>, vector<64x256xbf16>, vector<32x256xf32> -> vector<32x256xf32>
    %cst_64 = arith.constant dense<0.000000e+00> : vector<32x256xf32>
    %124 = tpu.matmul %122, %118, %cst_64 {dimension_numbers = #tpu.dot_dimension_numbers<[1], [0], [0], [1], [0, 0, 1, 1], [], []>} : vector<32x64xbf16>, vector<64x256xbf16>, vector<32x256xf32> -> vector<32x256xf32>
    %125 = arith.addf %123, %124 : vector<32x256xf32>
    %126 = arith.addf %116, %125 : vector<32x256xf32>
    %c3_65 = arith.constant 3 : index
    %c0_66 = arith.constant 0 : index
    %c0_67 = arith.constant 0 : index
    %127 = vector.load %arg2[%c3_65, %c0_66, %c0_67] : memref<4x64x256xbf16, #tpu.memory_space<vmem>>, vector<1x64x256xbf16>
    %128 = vector.shape_cast %127 : vector<1x64x256xbf16> to vector<64x256xbf16>
    %129 = arith.truncf %55 : vector<32x64xf32> to vector<32x64xbf16>
    %130 = arith.extf %129 : vector<32x64xbf16> to vector<32x64xf32>
    %131 = arith.subf %55, %130 : vector<32x64xf32>
    %132 = arith.truncf %131 : vector<32x64xf32> to vector<32x64xbf16>
    %cst_68 = arith.constant dense<0.000000e+00> : vector<32x256xf32>
    %133 = tpu.matmul %129, %128, %cst_68 {dimension_numbers = #tpu.dot_dimension_numbers<[1], [0], [0], [1], [0, 0, 1, 1], [], []>} : vector<32x64xbf16>, vector<64x256xbf16>, vector<32x256xf32> -> vector<32x256xf32>
    %cst_69 = arith.constant dense<0.000000e+00> : vector<32x256xf32>
    %134 = tpu.matmul %132, %128, %cst_69 {dimension_numbers = #tpu.dot_dimension_numbers<[1], [0], [0], [1], [0, 0, 1, 1], [], []>} : vector<32x64xbf16>, vector<64x256xbf16>, vector<32x256xf32> -> vector<32x256xf32>
    %135 = arith.addf %133, %134 : vector<32x256xf32>
    %136 = arith.addf %126, %135 : vector<32x256xf32>
    %c0_70 = arith.constant 0 : index
    %c0_71 = arith.constant 0 : index
    %c256 = arith.constant 256 : index
    %137 = vector.load %arg11[%c0_70, %c0_71, %c256] : memref<1x32x512xf32, #tpu.memory_space<vmem>>, vector<1x32x256xf32>
    %138 = vector.shape_cast %137 : vector<1x32x256xf32> to vector<32x256xf32>
    %139 = vector.shape_cast %136 : vector<32x256xf32> to vector<1x32x256xf32>
    tpu.vector_store %arg11[%c0_70, %c0_71, %c256], %139 {strides = array<i32>} : memref<1x32x512xf32, #tpu.memory_space<vmem>>, vector<1x32x256xf32>,
    return
  }
  func.func @transform_0(%arg0: i32, %arg1: i32) -> (i32, i32, i32) {
    %c0_i32 = arith.constant 0 : i32
    %c0_i32_0 = arith.constant 0 : i32
    %c0_i32_1 = arith.constant 0 : i32
    %c0_i32_2 = arith.constant 0 : i32
    return %c0_i32, %c0_i32_0, %c0_i32_1 : i32, i32, i32
  }
  func.func @transform_1(%arg0: i32, %arg1: i32) -> (i32, i32, i32) {
    %c0_i32 = arith.constant 0 : i32
    %c0_i32_0 = arith.constant 0 : i32
    return %arg0, %arg1, %c0_i32 : i32, i32, i32
  }
  func.func @transform_2(%arg0: i32, %arg1: i32) -> (i32, i32, i32) {
    %c0_i32 = arith.constant 0 : i32
    %c0_i32_0 = arith.constant 0 : i32
    return %arg0, %arg1, %c0_i32 : i32, i32, i32
  }
  func.func @transform_3(%arg0: i32, %arg1: i32) -> (i32, i32, i32) {
    %c0_i32 = arith.constant 0 : i32
    %c0_i32_0 = arith.constant 0 : i32
    return %arg0, %arg1, %c0_i32 : i32, i32, i32
  }
  func.func @transform_4(%arg0: i32, %arg1: i32) -> (i32, i32, i32) {
    %c0_i32 = arith.constant 0 : i32
    %c0_i32_0 = arith.constant 0 : i32
    return %arg0, %arg1, %c0_i32 : i32, i32, i32
  }
  func.func @transform_5(%arg0: i32, %arg1: i32) -> (i32, i32, i32) {
    %c0_i32 = arith.constant 0 : i32
    %c0_i32_0 = arith.constant 0 : i32
    return %arg0, %arg1, %c0_i32 : i32, i32, i32
  }
  func.func @transform_6(%arg0: i32, %arg1: i32) -> (i32, i32, i32) {
    %c0_i32 = arith.constant 0 : i32
    %c0_i32_0 = arith.constant 0 : i32
    return %arg0, %arg1, %c0_i32 : i32, i32, i32
  }
  func.func @transform_7(%arg0: i32, %arg1: i32) -> (i32, i32, i32) {
    %c0_i32 = arith.constant 0 : i32
    %c0_i32_0 = arith.constant 0 : i32
    return %arg0, %arg1, %c0_i32 : i32, i32, i32
  }
  func.func @transform_8(%arg0: i32, %arg1: i32) -> (i32, i32, i32) {
    %c0_i32 = arith.constant 0 : i32
    %c0_i32_0 = arith.constant 0 : i32
    return %arg0, %arg1, %c0_i32 : i32, i32, i32
  }
  func.func @transform_9(%arg0: i32, %arg1: i32) -> (i32, i32, i32) {
    %c0_i32 = arith.constant 0 : i32
    %c0_i32_0 = arith.constant 0 : i32
    return %arg0, %arg1, %c0_i32 : i32, i32, i32
  }
}

module attributes {stable_mosaic.version = 11 : i64} {
  func.func @_feature_copy_kernel(%arg0: i32, %arg1: i32, %arg2: i32, %arg3: memref<1x1x8x512xf32, #tpu.memory_space<vmem>>, %arg4: memref<2x7x8x512xf32, #tpu.memory_space<any>>, %arg5: memref<1x1x8x512xf32, #tpu.memory_space<vmem>>) attributes {dimension_semantics = [#tpu.dimension_semantics<parallel>, #tpu.dimension_semantics<parallel>, #tpu.dimension_semantics<parallel>], iteration_bounds = array<i64: 2, 3, 1>, scalar_prefetch = 0 : i64, scratch_operands = 0 : i64, tpu.core_type = #tpu.core_type<tc>, window_params = [{transform_indices = @transform_0, window_bounds = array<i64: 1, 1, 8, 512>}, {}, {transform_indices = @transform_2, window_bounds = array<i64: 1, 1, 8, 512>}]} {
    %c0 = arith.constant 0 : index
    %c0_0 = arith.constant 0 : index
    %c0_1 = arith.constant 0 : index
    %c0_2 = arith.constant 0 : index
    %0 = vector.load %arg3[%c0, %c0_0, %c0_1, %c0_2] : memref<1x1x8x512xf32, #tpu.memory_space<vmem>>, vector<1x1x8x512xf32>
    %c0_3 = arith.constant 0 : index
    %c0_4 = arith.constant 0 : index
    %c0_5 = arith.constant 0 : index
    %c0_6 = arith.constant 0 : index
    %1 = vector.load %arg5[%c0_3, %c0_4, %c0_5, %c0_6] : memref<1x1x8x512xf32, #tpu.memory_space<vmem>>, vector<1x1x8x512xf32>
    tpu.vector_store %arg5[%c0_3, %c0_4, %c0_5, %c0_6], %0 {strides = array<i32>} : memref<1x1x8x512xf32, #tpu.memory_space<vmem>>, vector<1x1x8x512xf32>,
    return
  }
  func.func @transform_0(%arg0: i32, %arg1: i32, %arg2: i32) -> (i32, i32, i32, i32) {
    %c0_i32 = arith.constant 0 : i32
    %c0_i32_0 = arith.constant 0 : i32
    return %arg0, %arg1, %arg2, %c0_i32 : i32, i32, i32, i32
  }
  func.func @transform_2(%arg0: i32, %arg1: i32, %arg2: i32) -> (i32, i32, i32, i32) {
    %c4_i32 = arith.constant 4 : i32
    %0 = arith.addi %c4_i32, %arg1 : i32
    %c0_i32 = arith.constant 0 : i32
    %c0_i32_0 = arith.constant 0 : i32
    return %arg0, %0, %arg2, %c0_i32 : i32, i32, i32, i32
  }
}

</mosaic_0001>

<bundles_post_ra>
// kernel: my_upsampling_idwt_3d.3
= control target key start
LH: loop header
LB: loop body
LE: loop exit
PB: predicated region body
PF: predicated region fallthrough
CT: control target
= control target key end

     0   :  { %s430_s9 = smov 0   ;;  %s432_s10 = smov 0   ;;  %s481_s0 = inlined_call_operand.vmem [shape: f32[2,3,8,512], index: 0, kind: input, shape index: {}]   ;;  %s482_s1 = inlined_call_operand.vmem [shape: f32[2,7,8,512], index: 1, kind: input, shape index: {}, may-alias: {1,2}]   ;;  %s483_s2 = inlined_call_operand.vmem [shape: f32[2,7,8,512], index: 2, kind: output, shape index: {}, may-alias: {1,2}]  }
   0x1   :  { %s434_s11 = smov 0   ;;  %s436_s12 = smov 0  }
   0x2   :  { %s438_s13 = smov 0  }
   0x3 LB: > { %s27_s1 = sadd.s32 1, %s405_s11  ;;  %s31_s14 = sadd.s32 1, %s409_s12  ;;  %s413_s13 = sphi %s438_s13, %s12_s13   ;;  %s409_s12 = sphi %s436_s12, %s487_s12   ;;  %s405_s11 = sphi %s434_s11, %s486_s11   ;;  %s401_s10 = sphi %s432_s10, %s485_s10   ;;  %s397_s9 = sphi %s430_s9, %s484_s9  }
   0x4   : > { %p29_p0 = scmp.ge.s32.totalorder %s27_s1, 3  ;;  %p326_p1 = scmp.ge.s32.totalorder %s413_s13, 1 }
   0x5   : > { %p125_p2 = scmp.lt.s32.totalorder %s413_s13, 7 }
   0x6   : > { %s489_s1 = smov (%p29_p0, %s27_s1), 0  ;;  %s491_s14 = smov (!%p29_p0, %s31_s14), %s409_s12 }
   0x7   : > { %p126_p3 = pnand %p326_p1, %p125_p2  ;;  %p33_p4 = scmp.ge.s32.totalorder %s491_s14, 2 }
   0x8   : > { %p162_p5 = scmp.lt.s32.totalorder (!%p126_p3), %s401_s10, 1  ;;  %p164_p6 = scmp.lt.s32.totalorder (!%p126_p3), %s397_s9, 2 }
   0x9   : > { %s493_s14 = smov (%p33_p4, %s491_s14), 0  ;;  %129 = sbr.rel (%p126_p3) target bundleno = 23 (0x17), region = 24 }
   0xa   : > { %s175_s15 = sadd.s32 (!%p126_p3), 4, %s397_s9 }
   0xb   : > { %p178_p7 = scmp.lt.s32.totalorder (!%p126_p3), %s175_s15, 6 }
   0xe   : > { %s495_s10 = smov (!%p162_p5, %s401_s10), 1  ;;  %s497_s9 = smov (!%p164_p6, %s397_s9), 2 }
   0xf   : > { %s333_s16 = smul.u32 12, %s495_s10  ;;  %s327_s17 = sshll.u32 %s497_s9, 2 }
  0x10   : > { %s334_s23 = smul.u32 28, %s495_s10  ;;  %s499_s15 = smov (!%p178_p7, %s175_s15), 6 }
  0x11   : > { %s172_s18 = sadd.s32 %s333_s16, %s327_s17  ;;  %s329_s24 = sshll.u32 %s499_s15, 2 }
  0x12   : > { %s328_s19 = sshll.u32 %s172_s18, 3  ;;  %s186_s25 = sadd.s32 %s334_s23, %s329_s24 }
  0x13   : > { %s174_s22 = scalar_lea.vmem %s481_s0, %s328_s19  ;;  %s330_s26 = sshll.u32 %s186_s25, 3 }
  0x14   : > { %v190_v0 = vld [vmem:[%s174_s22] sm:$0xff]  ;;  %v191_v1 = vld [vmem:[%s174_s22 + $0x8] sm:$0xff]  ;;  %v192_v2 = vld [vmem:[%s174_s22 + $0x10] sm:$0xff]  ;;  %s188_s29 = scalar_lea.vmem %s483_s2, %s330_s26 }
  0x15   : > { %v193_v3 = vld [vmem:[%s174_s22 + $0x18] sm:$0xff]  ;;  %194 = vst [vmem:[%s188_s29] sm:$0xff] %v190_v0  ;;  %195 = vst [vmem:[%s188_s29 + $0x8] sm:$0xff] %v191_v1 }
  0x16   : > { %196 = vst [vmem:[%s188_s29 + $0x10] sm:$0xff] %v192_v2  ;;  %197 = vst [vmem:[%s188_s29 + $0x18] sm:$0xff] %v193_v3 }
  0x17 PF: > { %s12_s13 = sadd.s32 1, %s413_s13   ;;  %s484_s9 = smov %s405_s11 }
  0x18   : > { %p9_p8 = scmp.ge.s32.totalorder %s12_s13, 8   ;;  %s485_s10 = smov %s409_s12 }
  0x19   : > { %s486_s11 = smov %s489_s1  ;;  %s487_s12 = smov %s493_s14 }
  0x1a   :  { %11 = sbr.rel (!%p9_p8) target bundleno = 3 (0x3), region = 54 }

// kernel: my_upsampling_idwt_3d.2
= control target key start
LH: loop header
LB: loop body
LE: loop exit
PB: predicated region body
PF: predicated region fallthrough
CT: control target
= control target key end

     0   :  { %s3024_s30 = smov 0   ;;  %s3026_s10 = smov 0   ;;  %s4087_s0 = inlined_call_operand.vmem [shape: bf16[4,64,256], index: 0, kind: input, shape index: {}]   ;;  %s4088_s1 = inlined_call_operand.vmem [shape: f32[2,32,64], index: 1, kind: input, shape index: {}]   ;;  %s4089_s2 = inlined_call_operand.vmem [shape: f32[2,32,64], index: 2, kind: input, shape index: {}]   ;;  %s4090_s3 = inlined_call_operand.vmem [shape: f32[2,32,64], index: 3, kind: input, shape index: {}]   ;;  %s4091_s4 = inlined_call_operand.vmem [shape: f32[2,32,64], index: 4, kind: input, shape index: {}]   ;;  %s4092_s5 = inlined_call_operand.vmem [shape: f32[2,32,64], index: 5, kind: input, shape index: {}]   ;;  %s4093_s6 = inlined_call_operand.vmem [shape: f32[2,32,64], index: 6, kind: input, shape index: {}]   ;;  %s4094_s7 = inlined_call_operand.vmem [shape: f32[2,32,64], index: 7, kind: input, shape index: {}]   ;;  %s4095_s8 = inlined_call_operand.vmem [shape: f32[2,32,64], index: 8, kind: input, shape index: {}]   ;;  %s4096_s9 = inlined_call_operand.vmem [shape: f32[2,56,512], index: 9, kind: output, shape index: {}]  }
   0x1   :  { %s3028_s11 = smov 0   ;;  %s3030_s12 = smov 0  }
   0x2   :  { %s3032_s13 = smov 0  }
   0x3 LB: > { %s2605_s14 = sadd.s32 4294967295, %s2967_s13   ;;  %s31_s15 = sadd.s32 1, %s2963_s12  ;;  %s2967_s13 = sphi %s3032_s13, %s19_s13   ;;  %s2963_s12 = sphi %s3030_s12, %s4182_s12   ;;  %s2959_s11 = sphi %s3028_s11, %s4181_s11   ;;  %s2955_s10 = sphi %s3026_s10, %s4180_s10   ;;  %s2951_s30 = sphi %s3024_s30, %s4179_s30  }
   0x4   : > { %p33_p0 = scmp.ge.s32.totalorder %s31_s15, 2  ;;  %s285_s16 = sadd.s32 1, %s2955_s10 }
   0x5   : > { %p295_p1 = scmp.ne.s32.totalorder %s2955_s10, %s2951_s30  ;;  %p296_p2 = scmp.eq.s32.totalorder %s2605_s14, 1 }
   0x6   : > { %s4184_s15 = smov (%p33_p0, %s31_s15), 0  ;;  %p2609_p4 = scmp.ge.s32.totalorder %s2967_s13, 1 }
   0x7   : > { %p3056_p3 = por %p296_p2, %p295_p1  ;;  %s280_s18 = ssub.s32 %s2963_s12, %s4184_s15 }
   0x8   : > { %p427_p5 = scmp.lt.s32.totalorder %s2967_s13, 3  ;;  %p283_p6 = scmp.eq.s32.totalorder %s280_s18, 0 }
   0xa   : > { %p428_p7 = pnand %p2609_p4, %p427_p5 }
   0xb   : > { %s3065_s19 = scalar_select %p283_p6, %s2955_s10, %s285_s16  }
   0xc   : > { %431 = sbr.rel (%p428_p7) target bundleno = 383 (0x17f), region = 56 }
  0x11   : > { %v3070_v0 = vld [vmem:[%s4087_s0 + $0x34] ss:$8 sps:$4 sm:$0xff]   ;;  %p530_p8 = scmp.lt.s32.totalorder %s2959_s11, 1  ;;  %v3076_v1 = vld [vmem:[%s4087_s0 + $0x30] ss:$8 sps:$4 sm:$0xff]   ;;  %v4108_v2 = vmov 0  }
  0x12   : > { %4131 = vst [vmem:[#allocation3_spill] sm:$0xff] %v3070_v0  ;;  %4132 = vst [vmem:[#allocation4_spill] sm:$0xff] %v3076_v1  ;;  %934 = vmatprep.mubr.bf16.mxu1 %v4108_v2  ;;  %875 = vmatprep.mubr.bf16.mxu0 %v4108_v2  ;;  %v3085_v3 = vld [vmem:[%s4087_s0 + $0x24] ss:$8 sps:$4 sm:$0xff]   ;;  %v3093_v4 = vld [vmem:[%s4087_s0 + $0x20] ss:$8 sps:$4 sm:$0xff]  }
  0x13   : > { %910 = vmatprep.subr.bf16.mxu1 %v3070_v0  ;;  %851 = vmatprep.subr.bf16.mxu0 %v3070_v0  ;;  %4133 = vst [vmem:[#allocation5_spill] sm:$0xff] %v3085_v3  ;;  %s531_s26 = scalar_select %p530_p8, %s2959_s11, 1  ;;  %4134 = vst [vmem:[#allocation6_spill] sm:$0xff] %v3093_v4  ;;  %v3100_v5 = vld [vmem:[%s4087_s0 + $0x14] ss:$8 sps:$4 sm:$0xff]   ;;  %vm836_vm0 = vcmask 523264  }
  0x14   : > { %911 = vmatpush1.bf16.msra.mxu1 %v3076_v1  ;;  %852 = vmatpush1.bf16.msra.mxu0 %v3076_v1  ;;  %4135 = vst [vmem:[#allocation7_spill] sm:$0xff] %v3100_v5  ;;  %v3105_v6 = vld [vmem:[%s4087_s0 + $0x10] ss:$8 sps:$4 sm:$0xff]   ;;  %v3120_v7 = vld [vmem:[%s4087_s0 + $0x4] ss:$8 sps:$4 sm:$0xff]   ;;  %s526_s29 = sand.u32 1, %s2951_s30  }
  0x15   : > { %912 = vmatprep.subr.bf16.mxu1 %v3085_v3  ;;  %853 = vmatprep.subr.bf16.mxu0 %v3085_v3  ;;  %s2783_s16 = sshll.u32 %s531_s26, 5  ;;  %4136 = vst [vmem:[#allocation8_spill] sm:$0xff] %v3105_v6  ;;  %4137 = vst [vmem:[#allocation9_spill] sm:$0xff] %v3120_v7  ;;  %v3176_v29 = vld [vmem:[%s4087_s0] ss:$8 sps:$4 sm:$0xff]  }
  0x16   : > { %s3110_s23 = scalar_lea.vmem %s4088_s1, %s2783_s16  ;;  %s3115_s27 = scalar_lea.vmem %s4089_s2, %s2783_s16  ;;  %4138 = vst [vmem:[#allocation10_spill] sm:$0xff] %v3176_v29  ;;  %v3186_v35 = vld [vmem:[%s4087_s0 + $0x74] ss:$8 sps:$4 sm:$0xff]  }
  0x17   : > { %s3125_s18 = scalar_lea.vmem %s4090_s3, %s2783_s16  ;;  %s3130_s22 = scalar_lea.vmem %s4091_s4, %s2783_s16  ;;  %v616_v8 = vld [vmem:[%s3110_s23] sm:$0xff]  ;;  %v617_v9 = vld [vmem:[%s3110_s23 + $0x8] sm:$0xff]  ;;  %4139 = vst [vmem:[#allocation11_spill] sm:$0xff] %v3186_v35  ;;  %v3207_v47 = vld [vmem:[%s3110_s23 + $0x10] sm:$0xff] }
  0x18   : > { %v620_v10 = vld [vmem:[%s3115_s27] sm:$0xff]  ;;  %913 = vmatpush1.bf16.msra.mxu1 %v3093_v4  ;;  %854 = vmatpush1.bf16.msra.mxu0 %v3093_v4  ;;  %s3140_s28 = scalar_lea.vmem %s4092_s5, %s2783_s16  ;;  %s3145_s14 = scalar_lea.vmem %s4093_s6, %s2783_s16  ;;  %v621_v11 = vld [vmem:[%s3115_s27 + $0x8] sm:$0xff]  ;;  %v3210_v48 = vld [vmem:[%s3110_s23 + $0x18] sm:$0xff] }
  0x19   : > { %v624_v12 = vld [vmem:[%s3125_s18] sm:$0xff]  ;;  %v625_v13 = vld [vmem:[%s3125_s18 + $0x8] sm:$0xff]  ;;  %914 = vmatprep.subr.bf16.mxu1 %v3100_v5  ;;  %855 = vmatprep.subr.bf16.mxu0 %v3100_v5  ;;  %s3155_s24 = scalar_lea.vmem %s4094_s7, %s2783_s16  ;;  %s3160_s26 = scalar_lea.vmem %s4095_s8, %s2783_s16  ;;  %v648_v17 = vadd.f32 %v620_v10, %v616_v8  ;;  %v649_v21 = vadd.f32 %v621_v11, %v617_v9  ;;  %v3181_v32 = vsub.f32 %v616_v8, %v620_v10  ;;  %v3213_v49 = vld [vmem:[%s3115_s27 + $0x10] sm:$0xff] }
  0x1a   : > { %v628_v14 = vld [vmem:[%s3130_s22] sm:$0xff]  ;;  %v629_v15 = vld [vmem:[%s3130_s22 + $0x8] sm:$0xff]  ;;  %v3188_v36 = vsub.f32 %v617_v9, %v621_v11  ;;  %v3223_v54 = vld [vmem:[%s3115_s27 + $0x18] sm:$0xff]  ;;  %s2791_s16 = smul.u32 (%p3056_p3), 224, %s2959_s11  ;;  %s4032_s23 = smov (%p3056_p3), 0  }
  0x1b   : > { %v632_v16 = vld [vmem:[%s3140_s28] sm:$0xff]  ;;  %v633_v18 = vld [vmem:[%s3140_s28 + $0x8] sm:$0xff]  ;;  %v656_v22 = vadd.f32 %v628_v14, %v624_v12  ;;  %v657_v23 = vadd.f32 %v629_v15, %v625_v13  ;;  %v3190_v37 = vsub.f32 %v624_v12, %v628_v14  ;;  %v3192_v38 = vsub.f32 %v625_v13, %v629_v15  ;;  %v3226_v55 = vld [vmem:[%s3125_s18 + $0x10] sm:$0xff] }
  0x1c   : > { %v636_v19 = vld [vmem:[%s3145_s14] sm:$0xff]  ;;  %v637_v20 = vld [vmem:[%s3145_s14 + $0x8] sm:$0xff]  ;;  %915 = vmatpush1.bf16.msra.mxu1 %v3105_v6  ;;  %856 = vmatpush1.bf16.msra.mxu0 %v3105_v6  ;;  %v630_v56 = vld [vmem:[%s3130_s22 + $0x10] sm:$0xff]  ;;  %s4030_s25 = scalar_lea.vmem (%p3056_p3), %s4096_s9, %s2791_s16  }
  0x1d   : > { %v640_v24 = vld [vmem:[%s3155_s24] sm:$0xff]  ;;  %v641_v25 = vld [vmem:[%s3155_s24 + $0x8] sm:$0xff]  ;;  %v664_v27 = vadd.f32 %v636_v19, %v632_v16  ;;  %v665_v28 = vadd.f32 %v637_v20, %v633_v18  ;;  %916 = vmatprep.subr.bf16.mxu1 %v3120_v7  ;;  %857 = vmatprep.subr.bf16.mxu0 %v3120_v7  ;;  %v680_v34 = vadd.f32 %v656_v22, %v648_v17  ;;  %v3235_v61 = vld [vmem:[%s3125_s18 + $0x18] sm:$0xff] }
  0x1e   : > { %v644_v26 = vld [vmem:[%s3160_s26] sm:$0xff]  ;;  %v645_v30 = vld [vmem:[%s3160_s26 + $0x8] sm:$0xff]  ;;  %v681_v39 = vadd.f32 %v657_v23, %v649_v21  ;;  %v3194_v40 = vsub.f32 %v632_v16, %v636_v19  ;;  %v3196_v41 = vsub.f32 %v633_v18, %v637_v20  ;;  %v3204_v46 = vsub.f32 %v648_v17, %v656_v22  ;;  %v3238_v62 = vld [vmem:[%s3130_s22 + $0x18] sm:$0xff] }
  0x1f   : > { %v672_v31 = vadd.f32 %v644_v26, %v640_v24  ;;  %v673_v33 = vadd.f32 %v645_v30, %v641_v25  ;;  %v3200_v44 = vsub.f32 %v640_v24, %v644_v26  ;;  %v3202_v45 = vsub.f32 %v641_v25, %v645_v30  ;;  %v3241_v63 = vld [vmem:[%s3140_s28 + $0x10] sm:$0xff]  ;;  %v3244_v8 = vld [vmem:[%s3140_s28 + $0x18] sm:$0xff]  ;;  %v3284_v24 = vld [vmem:[%s4087_s0 + $0x64] ss:$8 sps:$4 sm:$0xff]  }
  0x20   : > { %917 = vmatpush1.bf16.msra.mxu1 %v3176_v29  ;;  %858 = vmatpush1.bf16.msra.mxu0 %v3176_v29  ;;  %v3215_v50 = vsub.f32 %v649_v21, %v657_v23  ;;  %v3231_v57 = vadd.f32 %v3190_v37, %v3181_v32  ;;  %v3247_v9 = vld [vmem:[%s3145_s14 + $0x10] sm:$0xff]  ;;  %v3250_v10 = vld [vmem:[%s3145_s14 + $0x18] sm:$0xff]  ;;  %v3254_v11 = vadd.f32 %v3192_v38, %v3188_v36  ;;  %v3326_v13 = vld [vmem:[%s4087_s0 + $0x60] ss:$8 sps:$4 sm:$0xff]  }
  0x21   : > { %v696_v42 = vadd.f32 %v672_v31, %v664_v27  ;;  %v697_v43 = vadd.f32 %v673_v33, %v665_v28  ;;  %v3217_v51 = vsub.f32 %v664_v27, %v672_v31  ;;  %v3219_v52 = vsub.f32 %v665_v28, %v673_v33  ;;  %1089 = vmatprep.subr.bf16.mxu1 %v3186_v35  ;;  %v3261_v15 = vld [vmem:[%s3155_s24 + $0x10] sm:$0xff]  ;;  %v643_v25 = vld [vmem:[%s3155_s24 + $0x18] sm:$0xff] }
  0x22   : > { %1030 = vmatprep.subr.bf16.mxu0 %v3186_v35  ;;  %v3264_v16 = vld [vmem:[%s3160_s26 + $0x10] sm:$0xff]  ;;  %v3268_v17 = vadd.f32 %v3200_v44, %v3194_v40  ;;  %v3272_v21 = vadd.f32 %v3202_v45, %v3196_v41  ;;  %4141 = vst [vmem:[#allocation13_spill] sm:$0xff] %v3284_v24  ;;  %v3289_v26 = vadd.f32 %v3213_v49, %v3207_v47  ;;  %v647_v33 = vld [vmem:[%s3160_s26 + $0x18] sm:$0xff]  ;;  %4143 = vst [vmem:[#allocation15_spill] sm:$0xff] %v3326_v13  ;;  %s2610_s26 = sshll.u32 %s526_s29, 7 }
  0x23   : > { %v712_v53 = vadd.f32 %v696_v42, %v680_v34  ;;  %v713_v58 = vadd.f32 %v697_v43, %v681_v39  ;;  %v720_v59 = vsub.f32 %v680_v34, %v696_v42  ;;  %v721_v60 = vsub.f32 %v681_v39, %v697_v43  ;;  %v3279_v23 = vld [vmem:[%s4087_s0 + $0x70] ss:$8 sps:$4 sm:$0xff]   ;;  %s3950_s30 = scalar_lea.vmem [#allocation2], %s2610_s26  }
  0x24   : > { %v744_v22 = vadd.f32 %v3217_v51, %v3204_v46  ;;  %4140 = vst [vmem:[#allocation12_spill] sm:$0xff] %v3279_v23  ;;  %v3293_v27 = vadd.f32 %v3223_v54, %v3210_v48  ;;  %v745_v28 = vadd.f32 %v3219_v52, %v3215_v50  ;;  %v3301_v34 = vadd.f32 %v630_v56, %v3226_v55 }
  0x25   : > { %v716_v12 = vmul.f32 0.35355338, %v712_v53  ;;  %v717_v18 = vmul.f32 0.35355338, %v713_v58  ;;  %v724_v19 = vmul.f32 0.35355338, %v720_v59  ;;  %v3305_v39 = vadd.f32 %v3238_v62, %v3235_v61 }
  0x26   : > { %v725_v20 = vmul.f32 0.35355338, %v721_v60  ;;  %v3309_v42 = vadd.f32 %v3247_v9, %v3241_v63  ;;  %v3313_v43 = vadd.f32 %v3250_v10, %v3244_v8  ;;  %v3317_v53 = vadd.f32 %v3264_v16, %v3261_v15 }
  0x27   : > { %v784_v30 = vpack.c.bf16 %v717_v18, %v716_v12  ;;  %v3329_v35 = vadd.f32 %v647_v33, %v643_v25  ;;  %v3333_v29 = vadd.f32 %v3301_v34, %v3289_v26 }
  0x28   : > { %v3297_v31 = vpack.c.bf16 %v725_v20, %v724_v19  ;;  %v3351_v4 = vadd.f32 %v3317_v53, %v3309_v42 }
  0x29   : > { %2637 = vmatmul.mubr.msk.bf16.vlgmr.msra.gmra.mxu1 %vm836_vm0, %v784_v30  ;;  %v786_v60 = vunpack.c.l.bf16 %v784_v30  ;;  %v787_v14 = vunpack.c.h.bf16 %v784_v30  ;;  %v3355_v3 = vadd.f32 %v3329_v35, %v3313_v43 }
  0x2a   : > { %4142 = vst [vmem:[#allocation14_spill] sm:$0xff] %v3297_v31  ;;  %v1534_v58 = vunpack.c.l.bf16 %v3297_v31  ;;  %v1535_v59 = vunpack.c.h.bf16 %v3297_v31  ;;  %1090 = vmatpush1.bf16.msra.mxu1 %v3279_v23  ;;  %944 = vmatprep.mubr.bf16.mxu1 %v4108_v2  ;;  %v3337_v31 = vadd.f32 %v3305_v39, %v3293_v27  ;;  %v3347_v2 = vld [vmem:[%s4087_s0 + $0x54] ss:$8 sps:$4 sm:$0xff]  }
  0x2b   : > { %v790_v6 = vsub.f32 %v716_v12, %v786_v60  ;;  %v791_v5 = vsub.f32 %v717_v18, %v787_v14  ;;  %1091 = vmatprep.subr.bf16.mxu1 %v3284_v24  ;;  %4144 = vst [vmem:[#allocation16_spill] sm:$0xff] %v3347_v2  ;;  %v729_v12 = vadd.f32 %v3272_v21, %v3254_v11 }
  0x2c   : > { %v3339_v30 = vsub.f32 %v724_v19, %v1534_v58  ;;  %v3341_v7 = vsub.f32 %v725_v20, %v1535_v59  ;;  %v728_v19 = vadd.f32 %v3268_v17, %v3231_v57  ;;  %v3363_v18 = vsub.f32 %v3207_v47, %v3213_v49  ;;  %v3389_v49 = vld [vmem:[%s4087_s0 + $0x44] ss:$8 sps:$4 sm:$0xff]  }
  0x2d   : > { %v794_v14 = vpack.c.bf16 %v791_v5, %v790_v6  ;;  %v3367_v20 = vsub.f32 %v3210_v48, %v3223_v54  ;;  %v3370_v58 = vsub.f32 %v3226_v55, %v630_v56  ;;  %v714_v59 = vadd.f32 %v3351_v4, %v3333_v29  ;;  %v3380_v5 = vld [vmem:[%s4087_s0 + $0x50] ss:$8 sps:$4 sm:$0xff]  }
  0x2e   : > { %1092 = vmatpush1.bf16.msra.mxu1 %v3326_v13  ;;  %v715_v60 = vadd.f32 %v3355_v3, %v3337_v31  ;;  %v732_v6 = vmul.f32 0.35355338, %v728_v19  ;;  %v733_v47 = vmul.f32 0.35355338, %v729_v12  ;;  %v3382_v48 = vmul.f32 0.35355338, %v744_v22 }
  0x2f   : > { %2635 = vmatmul.mubr.msk.bf16.vlgmr.msra.gmra.mxu0 %vm836_vm0, %v794_v14  ;;  %1093 = vmatprep.subr.bf16.mxu1 %v3347_v2  ;;  %v3393_v54 = vsub.f32 %v3235_v61, %v3238_v62  ;;  %v3397_v55 = vsub.f32 %v3241_v63, %v3247_v9  ;;  %v3401_v56 = vsub.f32 %v3244_v8, %v3250_v10  ;;  %v3403_v22 = vmul.f32 0.35355338, %v745_v28 }
  0x30   : > { %1031 = vmatpush1.bf16.msra.mxu0 %v3279_v23  ;;  %v718_v19 = vmul.f32 0.35355338, %v714_v59  ;;  %v719_v12 = vmul.f32 0.35355338, %v715_v60  ;;  %v4147_v14 = vmov 0   ;;  %v3409_v61 = vsub.f32 %v3261_v15, %v3264_v16 }
  0x31   : > { %4145 = vst [vmem:[#allocation17_spill] sm:$0xff] %v3397_v55  ;;  %4146 = vst [vmem:[#allocation18_spill] sm:$0xff] %v3401_v56  ;;  %885 = vmatprep.mubr.bf16.mxu0 %v4147_v14  ;;  %1032 = vmatprep.subr.bf16.mxu0 %v3284_v24  ;;  %v964_v62 = vpack.c.bf16 %v733_v47, %v732_v6  ;;  %v3412_v63 = vsub.f32 %v643_v25, %v647_v33  ;;  %v3426_v15 = vld [vmem:[%s4087_s0 + $0x40] ss:$8 sps:$4 sm:$0xff]   ;;  %v3436_v25 = vld [vmem:[%s4087_s0 + $0xb4] ss:$8 sps:$4 sm:$0xff]  }
  0x32   : > { %v3416_v8 = vadd.f32 %v3370_v58, %v3363_v18  ;;  %v3420_v9 = vadd.f32 %v3393_v54, %v3367_v20  ;;  %v785_v10 = vpack.c.bf16 %v719_v12, %v718_v19  ;;  %1094 = vmatpush1.bf16.msra.mxu1 %v3380_v5  ;;  %v3430_v16 = vadd.f32 %v3409_v61, %v3397_v55 }
  0x33   : > { %4148 = vst [vmem:[#allocation19_spill] sm:$0xff] %v3412_v63  ;;  %1095 = vmatprep.subr.bf16.mxu1 %v3389_v49  ;;  %v3440_v28 = vadd.f32 %v3412_v63, %v3401_v56  ;;  %v3446_v60 = vpack.c.bf16 %v3403_v22, %v3382_v48  ;;  %v966_v24 = vunpack.c.l.bf16 %v964_v62  ;;  %v967_v23 = vunpack.c.h.bf16 %v964_v62 }
  0x34   : > { %4149 = vst [vmem:[#allocation20_spill] sm:$0xff] %v3416_v8  ;;  %2638 = vmatmul.mubr.msk.bf16.gmra.mxu1 %vm836_vm0, %v785_v10  ;;  %1033 = vmatpush1.bf16.msra.mxu0 %v3326_v13  ;;  %v788_v33 = vunpack.c.l.bf16 %v785_v10  ;;  %v789_v59 = vunpack.c.h.bf16 %v785_v10  ;;  %v730_v1 = vadd.f32 %v3430_v16, %v3416_v8  ;;  %v3463_v8 = vsub.f32 %v3293_v27, %v3305_v39  ;;  %v3493_v39 = vld [vmem:[%s4087_s0 + $0xa4] ss:$8 sps:$4 sm:$0xff]  }
  0x35   : > { %1034 = vmatprep.subr.bf16.mxu0 %v3347_v2  ;;  %1113 = vmatprep.mubr.bf16.mxu1 %v4147_v14  ;;  %v731_v0 = vadd.f32 %v3440_v28, %v3420_v9  ;;  %v3458_v2 = vsub.f32 %v3289_v26, %v3301_v34  ;;  %v1153_v26 = vunpack.c.l.bf16 %v3446_v60  ;;  %v1154_v27 = vunpack.c.h.bf16 %v3446_v60 }
  0x36   : > { %v792_v56 = vsub.f32 %v718_v19, %v788_v33  ;;  %v793_v13 = vsub.f32 %v719_v12, %v789_v59  ;;  %1096 = vmatpush1.bf16.msra.mxu1 %v3426_v15  ;;  %v734_v10 = vmul.f32 0.35355338, %v730_v1  ;;  %v3467_v19 = vsub.f32 %v3309_v42, %v3317_v53  ;;  %v3530_v42 = vld [vmem:[%s4087_s0 + $0x94] ss:$8 sps:$4 sm:$0xff]  }
  0x37   : > { %1276 = vmatprep.subr.bf16.mxu1 %v3436_v25  ;;  %v735_v63 = vmul.f32 0.35355338, %v731_v0  ;;  %v3471_v12 = vsub.f32 %v3313_v43, %v3329_v35  ;;  %v3477_v0 = vld [vmem:[%s4087_s0 + $0xb0] ss:$8 sps:$4 sm:$0xff]   ;;  %v970_v1 = vsub.f32 %v732_v6, %v966_v24  ;;  %v3483_v34 = vsub.f32 %v3181_v32, %v3190_v37 }
  0x38   : > { %v795_v55 = vpack.c.bf16 %v793_v13, %v792_v56  ;;  %1035 = vmatpush1.bf16.msra.mxu0 %v3380_v5  ;;  %v971_v13 = vsub.f32 %v733_v47, %v967_v23  ;;  %v3487_v35 = vsub.f32 %v3194_v40, %v3200_v44  ;;  %v3497_v24 = vsub.f32 %v3188_v36, %v3192_v38 }
  0x39   : > { %1036 = vmatprep.subr.bf16.mxu0 %v3389_v49  ;;  %v965_v23 = vpack.c.bf16 %v735_v63, %v734_v10  ;;  %v3501_v32 = vsub.f32 %v3196_v41, %v3202_v45  ;;  %v746_v37 = vadd.f32 %v3467_v19, %v3458_v2  ;;  %v747_v40 = vadd.f32 %v3471_v12, %v3463_v8  ;;  %v3517_v41 = vld [vmem:[%s4087_s0 + $0xa0] ss:$8 sps:$4 sm:$0xff]  }
  0x3a   : > { %2636 = vmatmul.mubr.msk.bf16.gmra.mxu0 %vm836_vm0, %v795_v55  ;;  %v1542_v36 = vpack.c.bf16 %v3341_v7, %v3339_v30  ;;  %v974_v38 = vpack.c.bf16 %v971_v13, %v970_v1  ;;  %v3520_v44 = vsub.f32 %v3382_v48, %v1153_v26  ;;  %v3523_v45 = vsub.f32 %v3403_v22, %v1154_v27  ;;  %v4152_v27 = vld [vmem:[#allocation17_spill] sm:$0xff] }
  0x3b   : > { %1054 = vmatprep.mubr.bf16.mxu0 %v4147_v14  ;;  %v968_v43 = vunpack.c.l.bf16 %v965_v23  ;;  %v969_v53 = vunpack.c.h.bf16 %v965_v23  ;;  %v760_v6 = vadd.f32 %v3487_v35, %v3483_v34  ;;  %v722_v47 = vsub.f32 %v3333_v29, %v3351_v4  ;;  %v3556_v29 = vld [vmem:[%s4087_s0 + $0x90] ss:$8 sps:$4 sm:$0xff]  }
  0x3c   : > { %1037 = vmatpush1.bf16.msra.mxu0 %v3426_v15  ;;  %2657 = vmatmul.mubr.msk.bf16.vlgmr.msra.gmra.mxu1 %vm836_vm0, %v964_v62  ;;  %v4150_v48 = vsub.f32 %v3204_v46, %v3217_v51  ;;  %v723_v56 = vsub.f32 %v3337_v31, %v3355_v3  ;;  %v3543_v22 = vmul.f32 0.35355338, %v746_v37  ;;  %v3545_v62 = vmul.f32 0.35355338, %v747_v40  ;;  %v3567_v31 = vld [vmem:[%s4087_s0 + $0x84] ss:$8 sps:$4 sm:$0xff]  }
  0x3d   : > { %1277 = vmatpush1.bf16.msra.mxu1 %v3477_v0  ;;  %1217 = vmatprep.subr.bf16.mxu0 %v3436_v25  ;;  %v761_v33 = vadd.f32 %v3501_v32, %v3497_v24  ;;  %v726_v59 = vmul.f32 0.35355338, %v722_v47  ;;  %v4151_v1 = vsub.f32 %v3215_v50, %v3219_v52  ;;  %v1161_v3 = vpack.c.bf16 %v3523_v45, %v3520_v44 }
  0x3e   : > { %1278 = vmatprep.subr.bf16.mxu1 %v3493_v39  ;;  %1123 = vmatprep.mubr.bf16.mxu1 %v4147_v14  ;;  %v3539_v55 = vmul.f32 0.35355338, %v4150_v48  ;;  %v727_v46 = vmul.f32 0.35355338, %v723_v56  ;;  %v736_v51 = vsub.f32 %v3231_v57, %v3268_v17  ;;  %v972_v50 = vsub.f32 %v734_v10, %v968_v43  ;;  %v4154_v43 = vld [vmem:[#allocation19_spill] sm:$0xff] }
  0x3f   : > { %v757_v4 = vmul.f32 0.35355338, %v4151_v1  ;;  %v973_v52 = vsub.f32 %v735_v63, %v969_v53  ;;  %v3569_v13 = vmul.f32 0.35355338, %v760_v6  ;;  %v3573_v26 = vsub.f32 %v3363_v18, %v3370_v58  ;;  %v4155_v53 = vld [vmem:[#allocation18_spill] sm:$0xff] }
  0x40   : > { %v3579_v57 = vsub.f32 %v3367_v20, %v3393_v54  ;;  %v3581_v17 = vpack.c.bf16 %v727_v46, %v726_v59  ;;  %v737_v63 = vsub.f32 %v3254_v11, %v3272_v21  ;;  %v740_v10 = vmul.f32 0.35355338, %v736_v51  ;;  %v4153_v54 = vld [vmem:[#allocation20_spill] sm:$0xff] }
  0x41   : > { %1279 = vmatpush1.bf16.msra.mxu1 %v3517_v41  ;;  %v3589_v18 = vpack.c.bf16 %v3545_v62, %v3543_v22  ;;  %v3591_v58 = vmul.f32 0.35355338, %v761_v33  ;;  %v3595_v20 = vsub.f32 %v4152_v27, %v3409_v61  ;;  %v738_v37 = vsub.f32 %v4153_v54, %v3430_v16  ;;  %v3603_v11 = vld [vmem:[%s4087_s0 + $0x80] ss:$8 sps:$4 sm:$0xff]   ;;  %v3614_v16 = vld [vmem:[%s4087_s0 + $0xf4] ss:$8 sps:$4 sm:$0xff]  }
  0x42   : > { %2655 = vmatmul.mubr.msk.bf16.vlgmr.msra.gmra.mxu0 %vm836_vm0, %v974_v38  ;;  %1280 = vmatprep.subr.bf16.mxu1 %v3530_v42  ;;  %v1536_v21 = vunpack.c.l.bf16 %v3581_v17  ;;  %v741_v40 = vmul.f32 0.35355338, %v737_v63  ;;  %v739_v61 = vsub.f32 %v3420_v9, %v3440_v28  ;;  %v975_v38 = vpack.c.bf16 %v973_v52, %v972_v50 }
  0x43   : > { %1218 = vmatpush1.bf16.msra.mxu0 %v3477_v0  ;;  %1064 = vmatprep.mubr.bf16.mxu0 %v4147_v14  ;;  %v3618_v6 = vsub.f32 %v4155_v53, %v4154_v43  ;;  %v742_v47 = vmul.f32 0.35355338, %v738_v37  ;;  %v3621_v48 = vpack.c.bf16 %v757_v4, %v3539_v55  ;;  %v1155_v1 = vunpack.c.l.bf16 %v3589_v18 }
  0x44   : > { %1219 = vmatprep.subr.bf16.mxu0 %v3493_v39  ;;  %2658 = vmatmul.mubr.msk.bf16.gmra.mxu1 %vm836_vm0, %v965_v23  ;;  %v1537_v23 = vunpack.c.h.bf16 %v3581_v17  ;;  %v3624_v56 = vsub.f32 %v726_v59, %v1536_v21  ;;  %v3628_v28 = vpack.c.bf16 %v741_v40, %v740_v10  ;;  %v743_v33 = vmul.f32 0.35355338, %v739_v61  ;;  %v3640_v59 = vld [vmem:[%s4087_s0 + $0xf0] ss:$8 sps:$4 sm:$0xff]  }
  0x45   : > { %1281 = vmatpush1.bf16.msra.mxu1 %v3556_v29  ;;  %1300 = vmatprep.mubr.bf16.mxu1 %v4147_v14  ;;  %v1898_v51 = vunpack.c.l.bf16 %v3621_v48  ;;  %v1899_v50 = vunpack.c.h.bf16 %v3621_v48  ;;  %v754_v52 = vsub.f32 %v3458_v2, %v3467_v19  ;;  %v3653_v2 = vld [vmem:[%s4087_s0 + $0xe4] ss:$8 sps:$4 sm:$0xff]   ;;  %v755_v21 = vsub.f32 %v3463_v8, %v3471_v12 }
  0x46   : > { %1282 = vmatprep.subr.bf16.mxu1 %v3567_v31  ;;  %v3626_v9 = vsub.f32 %v727_v46, %v1537_v23  ;;  %v1712_v63 = vunpack.c.l.bf16 %v3628_v28  ;;  %v1713_v27 = vunpack.c.h.bf16 %v3628_v28  ;;  %v3646_v54 = vpack.c.bf16 %v743_v33, %v742_v47 }
  0x47   : > { %1220 = vmatpush1.bf16.msra.mxu0 %v3517_v41  ;;  %v3656_v19 = vsub.f32 %v3539_v55, %v1898_v51  ;;  %v3658_v37 = vsub.f32 %v757_v4, %v1899_v50  ;;  %v758_v23 = vmul.f32 0.35355338, %v754_v52  ;;  %v759_v12 = vmul.f32 0.35355338, %v755_v21 }
  0x48   : > { %1221 = vmatprep.subr.bf16.mxu0 %v3530_v42  ;;  %v1543_v46 = vpack.c.bf16 %v3626_v9, %v3624_v56  ;;  %v3664_v61 = vsub.f32 %v740_v10, %v1712_v63  ;;  %v1714_v43 = vunpack.c.l.bf16 %v3646_v54  ;;  %v1715_v53 = vunpack.c.h.bf16 %v3646_v54  ;;  %v3683_v10 = vld [vmem:[%s4087_s0 + $0xe0] ss:$8 sps:$4 sm:$0xff]  }
  0x49   : > { %1283 = vmatpush1.bf16.msra.mxu1 %v3603_v11  ;;  %v768_v55 = vsub.f32 %v3483_v34, %v3487_v35  ;;  %v769_v4 = vsub.f32 %v3497_v24, %v3501_v32  ;;  %v3697_v35 = vld [vmem:[%s4087_s0 + $0xd4] ss:$8 sps:$4 sm:$0xff]   ;;  %v3699_v24 = vpack.c.bf16 %v759_v12, %v758_v23  ;;  %v770_v52 = vsub.f32 %v3573_v26, %v3595_v20 }
  0x4a   : > { %2656 = vmatmul.mubr.msk.bf16.gmra.mxu0 %vm836_vm0, %v975_v38  ;;  %1463 = vmatprep.subr.bf16.mxu1 %v3614_v16  ;;  %v3666_v38 = vsub.f32 %v741_v40, %v1713_v27  ;;  %v3689_v51 = vsub.f32 %v742_v47, %v1714_v43  ;;  %v3691_v34 = vsub.f32 %v743_v33, %v1715_v53 }
  0x4b   : > { %1222 = vmatpush1.bf16.msra.mxu0 %v3556_v29  ;;  %1241 = vmatprep.mubr.bf16.mxu0 %v4147_v14  ;;  %v772_v32 = vmul.f32 0.35355338, %v768_v55  ;;  %v773_v50 = vmul.f32 0.35355338, %v769_v4  ;;  %v1338_v47 = vpack.c.bf16 %v3591_v58, %v3569_v13  ;;  %v762_v33 = vadd.f32 %v3595_v20, %v3573_v26  ;;  %v3721_v26 = vld [vmem:[%s4087_s0 + $0xd0] ss:$8 sps:$4 sm:$0xff]  }
  0x4c   : > { %1223 = vmatprep.subr.bf16.mxu0 %v3567_v31  ;;  %2677 = vmatmul.mubr.msk.bf16.vlgmr.msra.gmra.mxu1 %vm836_vm0, %v3446_v60  ;;  %v1156_v60 = vunpack.c.h.bf16 %v3589_v18  ;;  %v771_v27 = vsub.f32 %v3579_v57, %v3618_v6  ;;  %v1900_v21 = vunpack.c.l.bf16 %v3699_v24  ;;  %v1901_v43 = vunpack.c.h.bf16 %v3699_v24 }
  0x4d   : > { %1464 = vmatpush1.bf16.msra.mxu1 %v3640_v59  ;;  %1310 = vmatprep.mubr.bf16.mxu1 %v4147_v14  ;;  %v3715_v53 = vpack.c.bf16 %v773_v50, %v772_v32  ;;  %v774_v55 = vmul.f32 0.35355338, %v770_v52  ;;  %v1159_v20 = vsub.f32 %v3543_v22, %v1155_v1  ;;  %v763_v8 = vadd.f32 %v3618_v6, %v3579_v57  ;;  %v3735_v52 = vld [vmem:[%s4087_s0 + $0xc4] ss:$8 sps:$4 sm:$0xff]   ;;  %v3760_v1 = vld [vmem:[%s4087_s0 + $0xc0] ss:$8 sps:$4 sm:$0xff]  }
  0x4e   : > { %1465 = vmatprep.subr.bf16.mxu1 %v3653_v2  ;;  %v1160_v4 = vsub.f32 %v3545_v62, %v1156_v60  ;;  %v775_v63 = vmul.f32 0.35355338, %v771_v27  ;;  %v3737_v40 = vsub.f32 %v758_v23, %v1900_v21  ;;  %v3739_v22 = vsub.f32 %v759_v12, %v1901_v43 }
  0x4f   : > { %1224 = vmatpush1.bf16.msra.mxu0 %v3603_v11  ;;  %v2084_v62 = vunpack.c.l.bf16 %v3715_v53  ;;  %v2085_v57 = vunpack.c.h.bf16 %v3715_v53  ;;  %v1340_v23 = vunpack.c.l.bf16 %v1338_v47  ;;  %v766_v12 = vmul.f32 0.35355338, %v762_v33 }
  0x50   : > { %1404 = vmatprep.subr.bf16.mxu0 %v3614_v16  ;;  %v3745_v44 = vpack.c.bf16 %v775_v63, %v774_v55  ;;  %v1907_v45 = vpack.c.bf16 %v3739_v22, %v3737_v40  ;;  %v1162_v27 = vpack.c.bf16 %v1160_v4, %v1159_v20  ;;  %v4156_v20 = vld [vmem:[#allocation3_spill] sm:$0xff]  ;;  %v4170_v7 = vpack.c.bf16 %v3666_v38, %v3664_v61 }
  0x51   : > { %1466 = vmatpush1.bf16.msra.mxu1 %v3683_v10  ;;  %v3754_v6 = vsub.f32 %v773_v50, %v2085_v57  ;;  %v767_v50 = vmul.f32 0.35355338, %v763_v8  ;;  %v1344_v8 = vsub.f32 %v3569_v13, %v1340_v23  ;;  %v4160_v23 = vld [vmem:[#allocation7_spill] sm:$0xff]  ;;  %v4171_v30 = vpack.c.bf16 %v3691_v34, %v3689_v51 }
  0x52   : > { %2675 = vmatmul.mubr.msk.bf16.vlgmr.msra.gmra.mxu0 %vm836_vm0, %v1161_v3  ;;  %1467 = vmatprep.subr.bf16.mxu1 %v3697_v35  ;;  %v3752_v3 = vsub.f32 %v772_v32, %v2084_v62  ;;  %v2087_v60 = vunpack.c.h.bf16 %v3745_v44  ;;  %v1341_v32 = vunpack.c.h.bf16 %v1338_v47 }
  0x53   : > { %1405 = vmatpush1.bf16.msra.mxu0 %v3640_v59  ;;  %1251 = vmatprep.mubr.bf16.mxu0 %v4147_v14  ;;  %v1339_v57 = vpack.c.bf16 %v767_v50, %v766_v12 }
  0x54   : > { %1406 = vmatprep.subr.bf16.mxu0 %v3653_v2  ;;  %2678 = vmatmul.mubr.msk.bf16.gmra.mxu1 %vm836_vm0, %v3589_v18  ;;  %v2086_v18 = vunpack.c.l.bf16 %v3745_v44  ;;  %v2092_v21 = vpack.c.bf16 %v3754_v6, %v3752_v3  ;;  %v3771_v62 = vsub.f32 %v775_v63, %v2087_v60  ;;  %v1345_v4 = vsub.f32 %v3591_v58, %v1341_v32  ;;  %v4157_v63 = vld [vmem:[#allocation4_spill] sm:$0xff]  ;;  %v4159_v58 = vld [vmem:[#allocation6_spill] sm:$0xff] }
  0x55   : > { %1468 = vmatpush1.bf16.msra.mxu1 %v3721_v26  ;;  %1487 = vmatprep.mubr.bf16.mxu1 %v4147_v14  ;;  %v1342_v60 = vunpack.c.l.bf16 %v1339_v57  ;;  %v1343_v13 = vunpack.c.h.bf16 %v1339_v57  ;;  %v4161_v32 = vld [vmem:[#allocation8_spill] sm:$0xff] }
  0x56   : > { %1469 = vmatprep.subr.bf16.mxu1 %v3735_v52  ;;  %v3769_v43 = vsub.f32 %v774_v55, %v2086_v18  ;;  %v1348_v55 = vpack.c.bf16 %v1345_v4, %v1344_v8  ;;  %v4158_v18 = vld [vmem:[#allocation5_spill] sm:$0xff]  ;;  %v4165_v4 = vld [vmem:[#allocation14_spill] sm:$0xff] }
  0x57   : > { %1407 = vmatpush1.bf16.msra.mxu0 %v3683_v10  ;;  %v4162_v8 = vld [vmem:[#allocation9_spill] sm:$0xff] }
  0x58   : > { %1408 = vmatprep.subr.bf16.mxu0 %v3697_v35  ;;  %v2093_v33 = vpack.c.bf16 %v3771_v62, %v3769_v43 }
  0x59   : > { %1470 = vmatpush1.bf16.msra.mxu1 %v3760_v1 }
  0x5a   : > { %2676 = vmatmul.mubr.msk.bf16.gmra.mxu0 %vm836_vm0, %v1162_v27  ;;  %1657 = vmatprep.subr.bf16.mxu1 %v4156_v20  ;;  %v1347_v27 = vsub.f32 %v767_v50, %v1343_v13  ;;  %v4164_v50 = vld [vmem:[#allocation11_spill] sm:$0xff] }
  0x5b   : > { %1409 = vmatpush1.bf16.msra.mxu0 %v3721_v26  ;;  %1428 = vmatprep.mubr.bf16.mxu0 %v4147_v14 }
  0x5c   : > { %1410 = vmatprep.subr.bf16.mxu0 %v3735_v52  ;;  %2697 = vmatmul.mubr.msk.bf16.vlgmr.msra.gmra.mxu1 %vm836_vm0, %v1338_v47  ;;  %v1346_v47 = vsub.f32 %v766_v12, %v1342_v60  ;;  %v4163_v12 = vld [vmem:[#allocation10_spill] sm:$0xff] }
  0x5d   : > { %1658 = vmatpush1.bf16.msra.mxu1 %v4157_v63  ;;  %1497 = vmatprep.mubr.bf16.mxu1 %v4147_v14 }
  0x5e   : > { %1659 = vmatprep.subr.bf16.mxu1 %v4158_v18 }
  0x5f   : > { %1411 = vmatpush1.bf16.msra.mxu0 %v3760_v1 }
  0x60   : > { %1598 = vmatprep.subr.bf16.mxu0 %v4156_v20  ;;  %v1349_v20 = vpack.c.bf16 %v1347_v27, %v1346_v47 }
  0x61   : > { %1660 = vmatpush1.bf16.msra.mxu1 %v4159_v58 }
  0x62   : > { %2695 = vmatmul.mubr.msk.bf16.vlgmr.msra.gmra.mxu0 %vm836_vm0, %v1348_v55  ;;  %1661 = vmatprep.subr.bf16.mxu1 %v4160_v23  ;;  %v4168_v55 = vld [vmem:[#allocation15_spill] sm:$0xff] }
  0x63   : > { %1599 = vmatpush1.bf16.msra.mxu0 %v4157_v63  ;;  %1438 = vmatprep.mubr.bf16.mxu0 %v4147_v14  ;;  %v4167_v63 = vld [vmem:[#allocation13_spill] sm:$0xff] }
  0x64   : > { %1600 = vmatprep.subr.bf16.mxu0 %v4158_v18  ;;  %2698 = vmatmul.mubr.msk.bf16.gmra.mxu1 %vm836_vm0, %v1339_v57  ;;  %v4166_v57 = vld [vmem:[#allocation12_spill] sm:$0xff] }
  0x65   : > { %1662 = vmatpush1.bf16.msra.mxu1 %v4161_v32  ;;  %1681 = vmatprep.mubr.bf16.mxu1 %v4147_v14  ;;  %v4169_v18 = vld [vmem:[#allocation16_spill] sm:$0xff] }
  0x66   : > { %1663 = vmatprep.subr.bf16.mxu1 %v4162_v8 }
  0x67   : > { %1601 = vmatpush1.bf16.msra.mxu0 %v4159_v58 }
  0x68   : > { %1602 = vmatprep.subr.bf16.mxu0 %v4160_v23 }
  0x69   : > { %1664 = vmatpush1.bf16.msra.mxu1 %v4163_v12 }
  0x6a   : > { %2696 = vmatmul.mubr.msk.bf16.gmra.mxu0 %vm836_vm0, %v1349_v20  ;;  %1835 = vmatprep.subr.bf16.mxu1 %v4164_v50 }
  0x6b   : > { %1603 = vmatpush1.bf16.msra.mxu0 %v4161_v32  ;;  %1622 = vmatprep.mubr.bf16.mxu0 %v4147_v14 }
  0x6c   : > { %1604 = vmatprep.subr.bf16.mxu0 %v4162_v8  ;;  %2709 = vmatmul.mubr.msk.bf16.vlgmr.msra.gmra.mxu1 %vm836_vm0, %v4165_v4 }
  0x6d   : > { %1836 = vmatpush1.bf16.msra.mxu1 %v4166_v57  ;;  %1691 = vmatprep.mubr.bf16.mxu1 %v4147_v14 }
  0x6e   : > { %1837 = vmatprep.subr.bf16.mxu1 %v4167_v63 }
  0x6f   : > { %1605 = vmatpush1.bf16.msra.mxu0 %v4163_v12 }
  0x70   : > { %1776 = vmatprep.subr.bf16.mxu0 %v4164_v50 }
  0x71   : > { %1838 = vmatpush1.bf16.msra.mxu1 %v4168_v55 }
  0x72   : > { %2707 = vmatmul.mubr.msk.bf16.vlgmr.msra.gmra.mxu0 %vm836_vm0, %v1542_v36  ;;  %1839 = vmatprep.subr.bf16.mxu1 %v4169_v18 }
  0x73   : > { %1777 = vmatpush1.bf16.msra.mxu0 %v4166_v57  ;;  %1632 = vmatprep.mubr.bf16.mxu0 %v4147_v14 }
  0x74   : > { %1778 = vmatprep.subr.bf16.mxu0 %v4167_v63  ;;  %2710 = vmatmul.mubr.msk.bf16.gmra.mxu1 %vm836_vm0, %v3581_v17 }
  0x75   : > { %1840 = vmatpush1.bf16.msra.mxu1 %v3380_v5  ;;  %1859 = vmatprep.mubr.bf16.mxu1 %v4147_v14 }
  0x76   : > { %1841 = vmatprep.subr.bf16.mxu1 %v3389_v49 }
  0x77   : > { %1779 = vmatpush1.bf16.msra.mxu0 %v4168_v55 }
  0x78   : > { %1780 = vmatprep.subr.bf16.mxu0 %v4169_v18 }
  0x79   : > { %1842 = vmatpush1.bf16.msra.mxu1 %v3426_v15 }
  0x7a   : > { %2708 = vmatmul.mubr.msk.bf16.gmra.mxu0 %vm836_vm0, %v1543_v46  ;;  %2021 = vmatprep.subr.bf16.mxu1 %v3436_v25 }
  0x7b   : > { %1781 = vmatpush1.bf16.msra.mxu0 %v3380_v5  ;;  %1800 = vmatprep.mubr.bf16.mxu0 %v4147_v14  ;;  %v4172_v5 = vpack.c.bf16 %v3658_v37, %v3656_v19 }
  0x7c   : > { %1782 = vmatprep.subr.bf16.mxu0 %v3389_v49  ;;  %2729 = vmatmul.mubr.msk.bf16.vlgmr.msra.gmra.mxu1 %vm836_vm0, %v3628_v28 }
  0x7d   : > { %2022 = vmatpush1.bf16.msra.mxu1 %v3477_v0  ;;  %1869 = vmatprep.mubr.bf16.mxu1 %v4147_v14 }
  0x7e   : > { %2023 = vmatprep.subr.bf16.mxu1 %v3493_v39 }
  0x7f   : > { %1783 = vmatpush1.bf16.msra.mxu0 %v3426_v15 }
  0x80   : > { %1962 = vmatprep.subr.bf16.mxu0 %v3436_v25 }
  0x81   : > { %2024 = vmatpush1.bf16.msra.mxu1 %v3517_v41 }
  0x82   : > { %2727 = vmatmul.mubr.msk.bf16.vlgmr.msra.gmra.mxu0 %vm836_vm0, %v4170_v7  ;;  %2025 = vmatprep.subr.bf16.mxu1 %v3530_v42 }
  0x83   : > { %1963 = vmatpush1.bf16.msra.mxu0 %v3477_v0  ;;  %1810 = vmatprep.mubr.bf16.mxu0 %v4147_v14 }
  0x84   : > { %1964 = vmatprep.subr.bf16.mxu0 %v3493_v39  ;;  %2730 = vmatmul.mubr.msk.bf16.gmra.mxu1 %vm836_vm0, %v3646_v54 }
  0x85   : > { %2026 = vmatpush1.bf16.msra.mxu1 %v3556_v29  ;;  %2045 = vmatprep.mubr.bf16.mxu1 %v4147_v14 }
  0x86   : > { %2027 = vmatprep.subr.bf16.mxu1 %v3567_v31 }
  0x87   : > { %1965 = vmatpush1.bf16.msra.mxu0 %v3517_v41 }
  0x88   : > { %1966 = vmatprep.subr.bf16.mxu0 %v3530_v42 }
  0x89   : > { %2028 = vmatpush1.bf16.msra.mxu1 %v3603_v11 }
  0x8a   : > { %2728 = vmatmul.mubr.msk.bf16.gmra.mxu0 %vm836_vm0, %v4171_v30  ;;  %2207 = vmatprep.subr.bf16.mxu1 %v3614_v16 }
  0x8b   : > { %1967 = vmatpush1.bf16.msra.mxu0 %v3556_v29  ;;  %1986 = vmatprep.mubr.bf16.mxu0 %v4147_v14 }
  0x8c   : > { %1968 = vmatprep.subr.bf16.mxu0 %v3567_v31  ;;  %2749 = vmatmul.mubr.msk.bf16.vlgmr.msra.gmra.mxu1 %vm836_vm0, %v3621_v48 }
  0x8d   : > { %2208 = vmatpush1.bf16.msra.mxu1 %v3640_v59  ;;  %2055 = vmatprep.mubr.bf16.mxu1 %v4147_v14 }
  0x8e   : > { %2209 = vmatprep.subr.bf16.mxu1 %v3653_v2 }
  0x8f   : > { %1969 = vmatpush1.bf16.msra.mxu0 %v3603_v11 }
  0x90   : > { %2148 = vmatprep.subr.bf16.mxu0 %v3614_v16 }
  0x91   : > { %2210 = vmatpush1.bf16.msra.mxu1 %v3683_v10 }
  0x92   : > { %2747 = vmatmul.mubr.msk.bf16.vlgmr.msra.gmra.mxu0 %vm836_vm0, %v4172_v5  ;;  %2211 = vmatprep.subr.bf16.mxu1 %v3697_v35 }
  0x93   : > { %2149 = vmatpush1.bf16.msra.mxu0 %v3640_v59  ;;  %1996 = vmatprep.mubr.bf16.mxu0 %v4147_v14 }
  0x94   : > { %2150 = vmatprep.subr.bf16.mxu0 %v3653_v2  ;;  %2750 = vmatmul.mubr.msk.bf16.gmra.mxu1 %vm836_vm0, %v3699_v24 }
  0x95   : > { %2212 = vmatpush1.bf16.msra.mxu1 %v3721_v26  ;;  %2231 = vmatprep.mubr.bf16.mxu1 %v4147_v14 }
  0x96   : > { %2213 = vmatprep.subr.bf16.mxu1 %v3735_v52 }
  0x97   : > { %2151 = vmatpush1.bf16.msra.mxu0 %v3683_v10 }
  0x98   : > { %2152 = vmatprep.subr.bf16.mxu0 %v3697_v35 }
  0x99   : > { %2214 = vmatpush1.bf16.msra.mxu1 %v3760_v1 }
  0x9a   : > { %2748 = vmatmul.mubr.msk.bf16.gmra.mxu0 %vm836_vm0, %v1907_v45 }
  0x9b   : > { %2153 = vmatpush1.bf16.msra.mxu0 %v3721_v26  ;;  %2172 = vmatprep.mubr.bf16.mxu0 %v4147_v14 }
  0x9c   : > { %2154 = vmatprep.subr.bf16.mxu0 %v3735_v52  ;;  %2769 = vmatmul.mubr.msk.bf16.vlgmr.msra.gmra.mxu1 %vm836_vm0, %v3715_v53 }
  0x9d   : > { %2241 = vmatprep.mubr.bf16.mxu1 %v4147_v14 }
  0x9f   : > { %2155 = vmatpush1.bf16.msra.mxu0 %v3760_v1 }
  0xa2   : > { %2767 = vmatmul.mubr.msk.bf16.vlgmr.msra.gmra.mxu0 %vm836_vm0, %v2092_v21 }
  0xa3   : > { %2182 = vmatprep.mubr.bf16.mxu0 %v4147_v14 }
  0xa4   : > { %2770 = vmatmul.mubr.msk.bf16.gmra.mxu1 %vm836_vm0, %v3745_v44 }
  0xaa   : > { %2768 = vmatmul.mubr.msk.bf16.gmra.mxu0 %vm836_vm0, %v2093_v33 }
  0xe9   : > { %v936_v49 = vpop.f32.mrf.mxu1 }
  0xeb   : > { %v938_v15 = vpop.f32.mrf.mxu1 }
  0xed   : > { %v940_v25 = vpop.f32.mrf.mxu1 }
  0xef   : > { %v877_v0 = vpop.f32.mrf.mxu0  ;;  %v3918_v39 = vpop.f32.mrf.mxu1 }
  0xf0   : > { %v937_v27 = vadd.f32 %v936_v49, %v877_v0 }
  0xf1   : > { %v879_v36 = vpop.f32.mrf.mxu0 }
  0xf2   : > { %v939_v4 = vadd.f32 %v938_v15, %v879_v36 }
  0xf3   : > { %v881_v41 = vpop.f32.mrf.mxu0 }
  0xf4   : > { %v3920_v42 = vpop.f32.mrf.mxu1  ;;  %v941_v55 = vadd.f32 %v940_v25, %v881_v41 }
  0xf5   : > { %v883_v29 = vpop.f32.mrf.mxu0 }
  0xf6   : > { %v3922_v14 = vpop.f32.mrf.mxu1 }
  0xf8   : > { %v3924_v31 = vpop.f32.mrf.mxu1 }
  0xfa   : > { %v3926_v17 = vpop.f32.mrf.mxu0  ;;  %v3928_v11 = vpop.f32.mrf.mxu1 }
  0xfb   : > { %4173 = vst [vmem:[#allocation17_spill] sm:$0xff] %v3928_v11  ;;  %v943_v11 = vadd.f32 %v3918_v39, %v883_v29  ;;  %v947_v25 = vadd.f32 %v3920_v42, %v3926_v17 }
  0xfc   : > { %v3930_v16 = vpop.f32.mrf.mxu0  ;;  %v1115_v48 = vpop.f32.mrf.mxu1 }
  0xfe   : > { %v3932_v56 = vpop.f32.mrf.mxu0  ;;  %v1117_v9 = vpop.f32.mrf.mxu1 }
 0x100   : > { %v3934_v28 = vpop.f32.mrf.mxu0  ;;  %v1119_v59 = vpop.f32.mrf.mxu1 }
 0x102   : > { %v1056_v46 = vpop.f32.mrf.mxu0  ;;  %v1121_v54 = vpop.f32.mrf.mxu1 }
 0x103   : > { %v1116_v58 = vadd.f32 %v1115_v48, %v1056_v46 }
 0x104   : > { %v1058_v2 = vpop.f32.mrf.mxu0  ;;  %v1125_v19 = vpop.f32.mrf.mxu1 }
 0x105   : > { %v1118_v32 = vadd.f32 %v1117_v9, %v1058_v2  ;;  %v1134_v57 = vadd.f32 %v1116_v58, %v937_v27 }
 0x106   : > { %v1060_v37 = vpop.f32.mrf.mxu0  ;;  %v1127_v61 = vpop.f32.mrf.mxu1 }
 0x107   : > { %v1120_v8 = vadd.f32 %v1119_v59, %v1060_v37  ;;  %v1135_v5 = vadd.f32 %v1118_v32, %v939_v4 }
 0x108   : > { %v1062_v38 = vpop.f32.mrf.mxu0  ;;  %v3936_v10 = vpop.f32.mrf.mxu1 }
 0x109   : > { %v1122_v18 = vadd.f32 %v1121_v54, %v1062_v38  ;;  %v1136_v49 = vadd.f32 %v1120_v8, %v941_v55 }
 0x10a   : > { %v1066_v40 = vpop.f32.mrf.mxu0  ;;  %v3938_v51 = vpop.f32.mrf.mxu1 }
 0x10b   : > { %v1126_v0 = vadd.f32 %v1125_v19, %v1066_v40  ;;  %v1137_v41 = vadd.f32 %v1122_v18, %v943_v11  ;;  %v949_v19 = vadd.f32 %v3922_v14, %v3930_v16 }
 0x10c   : > { %v1068_v34 = vpop.f32.mrf.mxu0  ;;  %v1302_v35 = vpop.f32.mrf.mxu1 }
 0x10d   : > { %v1128_v54 = vadd.f32 %v1127_v61, %v1068_v34  ;;  %v1138_v40 = vadd.f32 %v1126_v0, %v947_v25 }
 0x10e   : > { %v1070_v24 = vpop.f32.mrf.mxu0  ;;  %v1304_v53 = vpop.f32.mrf.mxu1 }
 0x10f   : > { %v1130_v42 = vadd.f32 %v3936_v10, %v1070_v24 }
 0x110   : > { %v3940_v26 = vpop.f32.mrf.mxu0  ;;  %v1306_v52 = vpop.f32.mrf.mxu1 }
 0x112   : > { %v1243_v22 = vpop.f32.mrf.mxu0  ;;  %v1308_v44 = vpop.f32.mrf.mxu1 }
 0x113   : > { %v1303_v20 = vadd.f32 %v1302_v35, %v1243_v22 }
 0x114   : > { %v1245_v45 = vpop.f32.mrf.mxu0  ;;  %v1312_v3 = vpop.f32.mrf.mxu1 }
 0x115   : > { %v1305_v63 = vadd.f32 %v1304_v53, %v1245_v45  ;;  %v951_v45 = vadd.f32 %v3924_v31, %v3932_v56 }
 0x116   : > { %v1247_v6 = vpop.f32.mrf.mxu0  ;;  %v1314_v1 = vpop.f32.mrf.mxu1 }
 0x117   : > { %v1307_v48 = vadd.f32 %v1306_v52, %v1247_v6  ;;  %v1322_v2 = vadd.f32 %v1305_v63, %v1135_v5  ;;  %v1132_v6 = vadd.f32 %v3938_v51, %v3940_v26 }
 0x118   : > { %v1249_v21 = vpop.f32.mrf.mxu0  ;;  %v3942_v43 = vpop.f32.mrf.mxu1 }
 0x119   : > { %v1309_v37 = vadd.f32 %v1308_v44, %v1249_v21  ;;  %v1323_v53 = vadd.f32 %v1307_v48, %v1136_v49 }
 0x11a   : > { %v1253_v62 = vpop.f32.mrf.mxu0  ;;  %v3944_v33 = vpop.f32.mrf.mxu1 }
 0x11b   : > { %4174 = vst [vmem:[#allocation20_spill] sm:$0xff] %v3944_v33  ;;  %v1321_v33 = vadd.f32 %v1303_v20, %v1134_v57  ;;  %v1313_v52 = vadd.f32 %v1312_v3, %v1253_v62  ;;  %v1324_v61 = vadd.f32 %v1309_v37, %v1137_v41  ;;  %v1139_v3 = vadd.f32 %v1128_v54, %v949_v19  ;;  %v4175_v62 = vld [vmem:[#allocation17_spill] sm:$0xff] }
 0x11c   : > { %v1255_v60 = vpop.f32.mrf.mxu0  ;;  %v1489_v13 = vpop.f32.mrf.mxu1 }
 0x11d   : > { %v1315_v34 = vadd.f32 %v1314_v1, %v1255_v60  ;;  %v1325_v21 = vadd.f32 %v1313_v52, %v1138_v40  ;;  %v1140_v60 = vadd.f32 %v1130_v42, %v951_v45 }
 0x11e   : > { %v1257_v23 = vpop.f32.mrf.mxu0  ;;  %v1491_v47 = vpop.f32.mrf.mxu1 }
 0x11f   : > { %v1317_v10 = vadd.f32 %v3942_v43, %v1257_v23  ;;  %v1326_v56 = vadd.f32 %v1315_v34, %v1139_v3 }
 0x120   : > { %v1259_v12 = vpop.f32.mrf.mxu0  ;;  %v1493_v50 = vpop.f32.mrf.mxu1 }
 0x121   : > { %v1327_v32 = vadd.f32 %v1317_v10, %v1140_v60 }
 0x122   : > { %v1430_v7 = vpop.f32.mrf.mxu0  ;;  %v1495_v30 = vpop.f32.mrf.mxu1  ;;  %v4176_v58 = vld [vmem:[#allocation20_spill] sm:$0xff] }
 0x123   : > { %v1490_v46 = vadd.f32 %v1489_v13, %v1430_v7  ;;  %v1319_v51 = vadd.f32 %v4176_v58, %v1259_v12 }
 0x124   : > { %v1432_v9 = vpop.f32.mrf.mxu0  ;;  %v1499_v59 = vpop.f32.mrf.mxu1 }
 0x125   : > { %v1508_v15 = vadd.f32 %v1490_v46, %v1321_v33  ;;  %v1492_v36 = vadd.f32 %v1491_v47, %v1432_v9  ;;  %v953_v33 = vadd.f32 %v4175_v62, %v3934_v28 }
 0x126   : > { %v1434_v38 = vpop.f32.mrf.mxu0  ;;  %v1501_v35 = vpop.f32.mrf.mxu1 }
 0x127   : > { %1516 = vst [vmem:[%s3950_s30] sm:$0xff] %v1508_v15  ;;  %v1509_v39 = vadd.f32 %v1492_v36, %v1322_v2  ;;  %v1494_v29 = vadd.f32 %v1493_v50, %v1434_v38  ;;  %v1141_v27 = vadd.f32 %v1132_v6, %v953_v33 }
 0x128   : > { %v1436_v17 = vpop.f32.mrf.mxu0  ;;  %v1503_v11 = vpop.f32.mrf.mxu1 }
 0x129   : > { %1517 = vst [vmem:[%s3950_s30 + $0x8] sm:$0xff] %v1509_v39  ;;  %v1510_v22 = vadd.f32 %v1494_v29, %v1323_v53  ;;  %v1496_v44 = vadd.f32 %v1495_v30, %v1436_v17  ;;  %v1328_v4 = vadd.f32 %v1319_v51, %v1141_v27 }
 0x12a   : > { %v1440_v14 = vpop.f32.mrf.mxu0  ;;  %v1505_v16 = vpop.f32.mrf.mxu1 }
 0x12b   : > { %1518 = vst [vmem:[%s3950_s30 + $0x20] sm:$0xff] %v1510_v22  ;;  %v1511_v24 = vadd.f32 %v1496_v44, %v1324_v61  ;;  %v1500_v1 = vadd.f32 %v1499_v59, %v1440_v14 }
 0x12c   : > { %v1442_v13 = vpop.f32.mrf.mxu0  ;;  %v3965_v31 = vpop.f32.mrf.mxu1 }
 0x12d   : > { %1519 = vst [vmem:[%s3950_s30 + $0x28] sm:$0xff] %v1511_v24  ;;  %v1512_v26 = vadd.f32 %v1500_v1, %v1325_v21  ;;  %v1502_v47 = vadd.f32 %v1501_v35, %v1442_v13 }
 0x12e   : > { %v1444_v43 = vpop.f32.mrf.mxu0  ;;  %v3969_v23 = vpop.f32.mrf.mxu1 }
 0x12f   : > { %1520 = vst [vmem:[%s3950_s30 + $0x40] sm:$0xff] %v1512_v26  ;;  %v1513_v28 = vadd.f32 %v1502_v47, %v1326_v56  ;;  %v1504_v20 = vadd.f32 %v1503_v11, %v1444_v43 }
 0x130   : > { %v1446_v8 = vpop.f32.mrf.mxu0  ;;  %v3972_v50 = vpop.f32.mrf.mxu1 }
 0x131   : > { %1521 = vst [vmem:[%s3950_s30 + $0x48] sm:$0xff] %v1513_v28  ;;  %v1514_v57 = vadd.f32 %v1504_v20, %v1327_v32  ;;  %v1506_v12 = vadd.f32 %v1505_v16, %v1446_v8 }
 0x132   : > { %v1624_v63 = vpop.f32.mrf.mxu0  ;;  %v3975_v55 = vpop.f32.mrf.mxu1 }
 0x133   : > { %1522 = vst [vmem:[%s3950_s30 + $0x60] sm:$0xff] %v1514_v57  ;;  %v1515_v18 = vadd.f32 %v1506_v12, %v1328_v4  ;;  %v1684_v58 = vadd.f32 %v3965_v31, %v1624_v63 }
 0x134   : > { %v1626_v7 = vpop.f32.mrf.mxu0  ;;  %v3978_v30 = vpop.f32.mrf.mxu1 }
 0x135   : > { %1523 = vst [vmem:[%s3950_s30 + $0x68] sm:$0xff] %v1515_v18  ;;  %v1686_v32 = vadd.f32 %v3969_v23, %v1626_v7 }
 0x136   : > { %v1628_v5 = vpop.f32.mrf.mxu0  ;;  %v3981_v48 = vpop.f32.mrf.mxu1 }
 0x137   : > { %v1688_v8 = vadd.f32 %v3972_v50, %v1628_v5 }
 0x138   : > { %v1630_v46 = vpop.f32.mrf.mxu0  ;;  %v3983_v49 = vpop.f32.mrf.mxu1 }
 0x139   : > { %v1690_v31 = vadd.f32 %v3975_v55, %v1630_v46 }
 0x13a   : > { %v3985_v0 = vpop.f32.mrf.mxu0  ;;  %v3987_v9 = vpop.f32.mrf.mxu1 }
 0x13b   : > { %v1694_v50 = vadd.f32 %v3978_v30, %v3985_v0 }
 0x13c   : > { %v3989_v59 = vpop.f32.mrf.mxu0  ;;  %v1861_v2 = vpop.f32.mrf.mxu1 }
 0x13d   : > { %v1696_v46 = vadd.f32 %v3981_v48, %v3989_v59 }
 0x13e   : > { %v3991_v37 = vpop.f32.mrf.mxu0  ;;  %v1863_v15 = vpop.f32.mrf.mxu1 }
 0x140   : > { %v3993_v36 = vpop.f32.mrf.mxu0  ;;  %v1865_v25 = vpop.f32.mrf.mxu1 }
 0x142   : > { %v1802_v41 = vpop.f32.mrf.mxu0  ;;  %v1867_v54 = vpop.f32.mrf.mxu1 }
 0x143   : > { %v1862_v60 = vadd.f32 %v1861_v2, %v1802_v41 }
 0x144   : > { %v1804_v38 = vpop.f32.mrf.mxu0  ;;  %v1871_v35 = vpop.f32.mrf.mxu1 }
 0x145   : > { %v1864_v51 = vadd.f32 %v1863_v15, %v1804_v38  ;;  %v1880_v28 = vadd.f32 %v1862_v60, %v1684_v58 }
 0x146   : > { %v1806_v53 = vpop.f32.mrf.mxu0  ;;  %v1873_v52 = vpop.f32.mrf.mxu1 }
 0x147   : > { %v1866_v47 = vadd.f32 %v1865_v25, %v1806_v53  ;;  %v1881_v18 = vadd.f32 %v1864_v51, %v1686_v32 }
 0x148   : > { %v1808_v39 = vpop.f32.mrf.mxu0  ;;  %v1875_v29 = vpop.f32.mrf.mxu1 }
 0x149   : > { %v1868_v4 = vadd.f32 %v1867_v54, %v1808_v39  ;;  %v1882_v63 = vadd.f32 %v1866_v47, %v1688_v8 }
 0x14a   : > { %v1812_v19 = vpop.f32.mrf.mxu0  ;;  %v3995_v40 = vpop.f32.mrf.mxu1 }
 0x14b   : > { %v1872_v15 = vadd.f32 %v1871_v35, %v1812_v19  ;;  %v1883_v5 = vadd.f32 %v1868_v4, %v1690_v31 }
 0x14c   : > { %v1814_v42 = vpop.f32.mrf.mxu0  ;;  %v2047_v17 = vpop.f32.mrf.mxu1 }
 0x14d   : > { %v1874_v54 = vadd.f32 %v1873_v52, %v1814_v42  ;;  %v1884_v35 = vadd.f32 %v1872_v15, %v1694_v50  ;;  %v1698_v52 = vadd.f32 %v3983_v49, %v3991_v37 }
 0x14e   : > { %v1816_v11 = vpop.f32.mrf.mxu0  ;;  %v2049_v61 = vpop.f32.mrf.mxu1 }
 0x14f   : > { %v1876_v19 = vadd.f32 %v1875_v29, %v1816_v11  ;;  %v1885_v42 = vadd.f32 %v1874_v54, %v1696_v46 }
 0x150   : > { %v3997_v34 = vpop.f32.mrf.mxu0  ;;  %v2051_v22 = vpop.f32.mrf.mxu1 }
 0x152   : > { %v1988_v44 = vpop.f32.mrf.mxu0  ;;  %v2053_v45 = vpop.f32.mrf.mxu1 }
 0x153   : > { %v2048_v26 = vadd.f32 %v2047_v17, %v1988_v44 }
 0x154   : > { %v1990_v3 = vpop.f32.mrf.mxu0  ;;  %v2057_v6 = vpop.f32.mrf.mxu1 }
 0x155   : > { %v2050_v20 = vadd.f32 %v2049_v61, %v1990_v3  ;;  %v2066_v2 = vadd.f32 %v2048_v26, %v1880_v28 }
 0x156   : > { %v1992_v14 = vpop.f32.mrf.mxu0  ;;  %v2059_v16 = vpop.f32.mrf.mxu1 }
 0x157   : > { %v2052_v41 = vadd.f32 %v2051_v22, %v1992_v14  ;;  %v2067_v53 = vadd.f32 %v2050_v20, %v1881_v18 }
 0x158   : > { %v1994_v21 = vpop.f32.mrf.mxu0  ;;  %v2061_v10 = vpop.f32.mrf.mxu1 }
 0x159   : > { %v2054_v23 = vadd.f32 %v2053_v45, %v1994_v21  ;;  %v2068_v61 = vadd.f32 %v2052_v41, %v1882_v63 }
 0x15a   : > { %v1998_v24 = vpop.f32.mrf.mxu0  ;;  %v3999_v1 = vpop.f32.mrf.mxu1 }
 0x15b   : > { %4177 = vst [vmem:[#allocation19_spill] sm:$0xff] %v3999_v1  ;;  %v2058_v22 = vadd.f32 %v2057_v6, %v1998_v24  ;;  %v2069_v14 = vadd.f32 %v2054_v23, %v1883_v5  ;;  %v1878_v6 = vadd.f32 %v3995_v40, %v3997_v34 }
 0x15c   : > { %v2000_v62 = vpop.f32.mrf.mxu0  ;;  %v2233_v33 = vpop.f32.mrf.mxu1 }
 0x15d   : > { %v2060_v21 = vadd.f32 %v2059_v16, %v2000_v62  ;;  %v2070_v48 = vadd.f32 %v2058_v22, %v1884_v35  ;;  %v1700_v16 = vadd.f32 %v3987_v9, %v3993_v36 }
 0x15e   : > { %v2002_v13 = vpop.f32.mrf.mxu0  ;;  %v2235_v56 = vpop.f32.mrf.mxu1 }
 0x15f   : > { %v2062_v59 = vadd.f32 %v2061_v10, %v2002_v13  ;;  %v2071_v60 = vadd.f32 %v2060_v21, %v1885_v42  ;;  %v1887_v13 = vadd.f32 %v1878_v6, %v1700_v16 }
 0x160   : > { %v2004_v43 = vpop.f32.mrf.mxu0  ;;  %v2237_v27 = vpop.f32.mrf.mxu1 }
 0x162   : > { %v2174_v57 = vpop.f32.mrf.mxu0  ;;  %v2239_v12 = vpop.f32.mrf.mxu1  ;;  %v4178_v49 = vld [vmem:[#allocation19_spill] sm:$0xff] }
 0x163   : > { %v2234_v1 = vadd.f32 %v2233_v33, %v2174_v57  ;;  %v2064_v37 = vadd.f32 %v4178_v49, %v2004_v43 }
 0x164   : > { %v2176_v25 = vpop.f32.mrf.mxu0  ;;  %v2243_v38 = vpop.f32.mrf.mxu1 }
 0x165   : > { %v2252_v7 = vadd.f32 %v2234_v1, %v2066_v2  ;;  %v2236_v17 = vadd.f32 %v2235_v56, %v2176_v25  ;;  %v1886_v1 = vadd.f32 %v1876_v19, %v1698_v52  ;;  %v2073_v36 = vadd.f32 %v2064_v37, %v1887_v13 }
 0x166   : > { %v2178_v39 = vpop.f32.mrf.mxu0  ;;  %v2245_v3 = vpop.f32.mrf.mxu1 }
 0x167   : > { %2260 = vst [vmem:[%s3950_s30 + $0x10] sm:$0xff] %v2252_v7  ;;  %v2253_v44 = vadd.f32 %v2236_v17, %v2067_v53  ;;  %v2238_v55 = vadd.f32 %v2237_v27, %v2178_v39  ;;  %v2072_v56 = vadd.f32 %v2062_v59, %v1886_v1 }
 0x168   : > { %v2180_v45 = vpop.f32.mrf.mxu0  ;;  %v2247_v62 = vpop.f32.mrf.mxu1 }
 0x169   : > { %2261 = vst [vmem:[%s3950_s30 + $0x18] sm:$0xff] %v2253_v44  ;;  %v2254_v30 = vadd.f32 %v2238_v55, %v2068_v61  ;;  %v2240_v0 = vadd.f32 %v2239_v12, %v2180_v45 }
 0x16a   : > { %v2184_v24 = vpop.f32.mrf.mxu0  ;;  %v2249_v26 = vpop.f32.mrf.mxu1 }
 0x16b   : > { %2262 = vst [vmem:[%s3950_s30 + $0x30] sm:$0xff] %v2254_v30  ;;  %v2255_v29 = vadd.f32 %v2240_v0, %v2069_v14  ;;  %v2244_v11 = vadd.f32 %v2243_v38, %v2184_v24 }
 0x16c   : > { %v2186_v33 = vpop.f32.mrf.mxu0 }
 0x16d   : > { %2263 = vst [vmem:[%s3950_s30 + $0x38] sm:$0xff] %v2255_v29  ;;  %v2256_v40 = vadd.f32 %v2244_v11, %v2070_v48  ;;  %v2246_v34 = vadd.f32 %v2245_v3, %v2186_v33 }
 0x16e   : > { %v2188_v10 = vpop.f32.mrf.mxu0 }
 0x16f   : > { %2264 = vst [vmem:[%s3950_s30 + $0x50] sm:$0xff] %v2256_v40  ;;  %v2257_v58 = vadd.f32 %v2246_v34, %v2071_v60  ;;  %v2248_v51 = vadd.f32 %v2247_v62, %v2188_v10 }
 0x170   : > { %v2190_v9 = vpop.f32.mrf.mxu0 }
 0x171   : > { %2265 = vst [vmem:[%s3950_s30 + $0x58] sm:$0xff] %v2257_v58  ;;  %v2258_v47 = vadd.f32 %v2248_v51, %v2072_v56  ;;  %v2250_v27 = vadd.f32 %v2249_v26, %v2190_v9  ;;  %2274 = sbr.rel (!%p3056_p3) target bundleno = 383 (0x17f), region = 60 }
 0x173   : > { %2266 = vst [vmem:[%s3950_s30 + $0x70] sm:$0xff] %v2258_v47  ;;  %v2259_v32 = vadd.f32 %v2250_v27, %v2073_v36 }
 0x175   : > { %2267 = vst [vmem:[%s3950_s30 + $0x78] sm:$0xff] %v2259_v32 }
 0x176 LB: >> { %v2302_v43 = vld [vmem:[%s3950_s30] sm:$0xff]  ;;  %v2310_v4 = vld [vmem:[%s3950_s30 + $0x8] sm:$0xff]  ;;  %v2318_v2 = vld [vmem:[%s3950_s30 + $0x10] sm:$0xff]  ;;  %s2296_s23 = sadd.s32 1, %s2971_s23   ;;  %s2971_s23 = sphi %s4032_s23, %s2296_s23  }
 0x177   : >> { %v2304_v28 = vld [vmem:[%s3950_s30 + $0x20] sm:$0xff]  ;;  %2303 = vst [vmem:[%s4030_s25] sm:$0xff] %v2302_v43  ;;  %v2312_v57 = vld [vmem:[%s3950_s30 + $0x28] sm:$0xff]  ;;  %2311 = vst [vmem:[%s4030_s25 + $0x8] sm:$0xff] %v2310_v4  ;;  %p2295_p9 = scmp.ge.s32.totalorder %s2296_s23, 1 }
 0x178   : >> { %v2306_v20 = vld [vmem:[%s3950_s30 + $0x40] sm:$0xff]  ;;  %2305 = vst [vmem:[%s4030_s25 + $0x20] sm:$0xff] %v2304_v28  ;;  %2313 = vst [vmem:[%s4030_s25 + $0x28] sm:$0xff] %v2312_v57  ;;  %v2314_v12 = vld [vmem:[%s3950_s30 + $0x48] sm:$0xff] }
 0x179   : >> { %2307 = vst [vmem:[%s4030_s25 + $0x40] sm:$0xff] %v2306_v20  ;;  %v2308_v8 = vld [vmem:[%s3950_s30 + $0x60] sm:$0xff]  ;;  %v2316_v18 = vld [vmem:[%s3950_s30 + $0x68] sm:$0xff]  ;;  %2315 = vst [vmem:[%s4030_s25 + $0x48] sm:$0xff] %v2314_v12 }
 0x17a   : >> { %2309 = vst [vmem:[%s4030_s25 + $0x60] sm:$0xff] %v2308_v8  ;;  %2317 = vst [vmem:[%s4030_s25 + $0x68] sm:$0xff] %v2316_v18  ;;  %v2320_v41 = vld [vmem:[%s3950_s30 + $0x30] sm:$0xff]  ;;  %v2326_v15 = vld [vmem:[%s3950_s30 + $0x18] sm:$0xff]  ;;  %2298 = sbr.rel (!%p2295_p9) target bundleno = 374 (0x176), region = 142 }
 0x17b   : >> { %2319 = vst [vmem:[%s4030_s25 + $0x10] sm:$0xff] %v2318_v2  ;;  %v2322_v31 = vld [vmem:[%s3950_s30 + $0x50] sm:$0xff]  ;;  %2321 = vst [vmem:[%s4030_s25 + $0x30] sm:$0xff] %v2320_v41  ;;  %v2328_v25 = vld [vmem:[%s3950_s30 + $0x38] sm:$0xff] }
 0x17c   : >> { %v2324_v63 = vld [vmem:[%s3950_s30 + $0x70] sm:$0xff]  ;;  %2323 = vst [vmem:[%s4030_s25 + $0x50] sm:$0xff] %v2322_v31  ;;  %v2330_v38 = vld [vmem:[%s3950_s30 + $0x58] sm:$0xff]  ;;  %2327 = vst [vmem:[%s4030_s25 + $0x18] sm:$0xff] %v2326_v15 }
 0x17d   : >> { %2325 = vst [vmem:[%s4030_s25 + $0x70] sm:$0xff] %v2324_v63  ;;  %2329 = vst [vmem:[%s4030_s25 + $0x38] sm:$0xff] %v2328_v25  ;;  %v2332_v53 = vld [vmem:[%s3950_s30 + $0x78] sm:$0xff] }
 0x17e   : >> { %2331 = vst [vmem:[%s4030_s25 + $0x58] sm:$0xff] %v2330_v38  ;;  %2333 = vst [vmem:[%s4030_s25 + $0x78] sm:$0xff] %v2332_v53 }
 0x17f PF: > { %s19_s13 = sadd.s32 1, %s2967_s13   ;;  %s4179_s30 = smov %s2955_s10 }
 0x180   : > { %p16_p10 = scmp.ge.s32.totalorder %s19_s13, 4   ;;  %s4180_s10 = smov %s3065_s19 }
 0x181   : > { %s4181_s11 = smov %s2963_s12  ;;  %s4182_s12 = smov %s4184_s15 }
 0x182   :  { %18 = sbr.rel (!%p16_p10) target bundleno = 3 (0x3), region = 164 }

</bundles_post_ra>
